<compile_context>
chip_gen: v5e
topology: v5e:2x2
jax: 0.10.0
libtpu: 0.0.40
codegen_flags: <defaults>
</compile_context>

<pallas_src>
import math
import jax
import jax.numpy as jnp
from jax import lax
from jax.experimental import pallas as pl
from jax.experimental.pallas import tpu as pltpu

# ---------------- small deterministic config (stands in for HF config) -------
B, S, H = 2, 8, 32          # batch, seq, hidden
NH, DH = 4, 8               # heads, head dim (NH * DH == H)
FF = 64                     # intermediate size
VOCAB = 128                 # config.num_labels (MLM / token-cls head width)
NUM_LAYERS = 2
LN_EPS = 1e-12
NEG_INF = -1e9
IGNORE_INDEX = -100
T = B * S                   # flattened token count


# ---------------- in-kernel helpers ------------------------------------------
def _layer_norm(x, gamma, beta, eps=LN_EPS):
    mean = jnp.mean(x, axis=-1, keepdims=True)
    var = jnp.mean((x - mean) ** 2, axis=-1, keepdims=True)
    return (x - mean) * lax.rsqrt(var + eps) * gamma + beta


def _erf_approx(x):
    # Abramowitz & Stegun 7.1.26 polynomial erf, |abs err| <= 1.5e-7 (VPU + one EUP exp).
    # TODO(synk): at real FF sizes on v5e this polynomial can saturate the VALU slot;
    #             switch to a tanh-GELU (single EUP op) if the config allows.
    a1, a2, a3, a4, a5 = 0.254829592, -0.284496736, 1.421413741, -1.453152027, 1.061405429
    p = 0.3275911
    ax = jnp.abs(x)
    t = 1.0 / (1.0 + p * ax)
    poly = ((((a5 * t + a4) * t + a3) * t + a2) * t + a1) * t
    y = 1.0 - poly * jnp.exp(-ax * ax)
    return jnp.where(x >= 0.0, y, -y)


def _gelu_erf(x):
    # HF BERT exact erf-GELU: 0.5 * x * (1 + erf(x / sqrt(2)))
    return 0.5 * x * (1.0 + _erf_approx(x * (1.0 / math.sqrt(2.0))))


# ---------------- fused forward Pallas kernel (one grid step == one layer) ----
def _encoder_kernel(emb_ref, add_mask_ref, labels_ref,
                    emb_ln_g_ref, emb_ln_b_ref,
                    wq_ref, bq_ref, wk_ref, bk_ref, wv_ref, bv_ref,
                    wo_ref, bo_ref, ln1g_ref, ln1b_ref,
                    w1_ref, b1_ref, w2_ref, b2_ref,
                    ln2g_ref, ln2b_ref,
                    cls_w_ref, cls_b_ref,
                    logits_ref, loss_ref,
                    h_ref, ctx_ref):
    layer = pl.program_id(0)
    scale = 1.0 / math.sqrt(DH)

    # ---- layer 0: embedding LayerNorm initializes the carried hidden state ---
    @pl.when(layer == 0)
    def _init():
        h_ref[...] = _layer_norm(emb_ref[...], emb_ln_g_ref[...], emb_ln_b_ref[...])

    h = h_ref[...]                                   # (T, H) f32, VMEM-resident carry
    h16 = h.astype(jnp.bfloat16)

    # ---- lane-aligned Q/K/V projections (bf16 MXU operands, f32 accumulate) --
    q = jnp.dot(h16, wq_ref[...], preferred_element_type=jnp.float32) + bq_ref[...]
    k = jnp.dot(h16, wk_ref[...], preferred_element_type=jnp.float32) + bk_ref[...]
    v = jnp.dot(h16, wv_ref[...], preferred_element_type=jnp.float32) + bv_ref[...]

    # ---- attention: per-head contexts go straight into the ctx scratch -------
    for b in range(B):                               # static loop over batch
        rows = slice(b * S, (b + 1) * S)
        qb = q[rows, :]                              # (S, H) sublane slice
        kbT = k[rows, :].T                           # ONE transpose per (batch, layer)
        vb = v[rows, :]
        amask = add_mask_ref[b]                      # (1, S) additive key mask
        for hd in range(NH):                         # static loop over heads
            cs = slice(hd * DH, (hd + 1) * DH)
            # kbT[cs, :] is a free sublane slice (DH == 8 == sublane group)
            sc = jnp.dot(qb[:, cs], kbT[cs, :],
                         preferred_element_type=jnp.float32) * scale + amask
            sc = sc - jnp.max(sc, axis=-1, keepdims=True)
            p = jnp.exp(sc)
            p = p * pl.reciprocal(jnp.sum(p, axis=-1, keepdims=True), approx=True)
            ctx_ref[rows, cs] = jnp.dot(p, vb[:, cs],
                                        preferred_element_type=jnp.float32)

    # ---- single fused output projection + residual + LN ----------------------
    attn = jnp.dot(ctx_ref[...].astype(jnp.bfloat16), wo_ref[...],
                   preferred_element_type=jnp.float32) + bo_ref[...]
    h1 = _layer_norm(h + attn, ln1g_ref[...], ln1b_ref[...])

    # ---- feed forward ---------------------------------------------------------
    ff = jnp.dot(h1.astype(jnp.bfloat16), w1_ref[...],
                 preferred_element_type=jnp.float32) + b1_ref[...]
    ff = _gelu_erf(ff)
    ff = jnp.dot(ff.astype(jnp.bfloat16), w2_ref[...],
                 preferred_element_type=jnp.float32) + b2_ref[...]
    h_new = _layer_norm(h1 + ff, ln2g_ref[...], ln2b_ref[...])
    h_ref[...] = h_new                               # carry to next layer

    # ---- last layer: classifier + cross entropy (ignore_index=-100, mean) ----
    @pl.when(layer == NUM_LAYERS - 1)
    def _final():
        logits = jnp.dot(h_new.astype(jnp.bfloat16), cls_w_ref[...],
                         preferred_element_type=jnp.float32) + cls_b_ref[...]
        logits_ref[...] = logits                     # lane-dense (last dim = 128)

        labels = labels_ref[...]                     # (T, 1) i32
        m = jnp.max(logits, axis=-1, keepdims=True)
        lse = m + jnp.log(jnp.sum(jnp.exp(logits - m), axis=-1, keepdims=True))
        class_ids = lax.broadcasted_iota(jnp.int32, logits.shape, 1)
        picked = jnp.sum(jnp.where(class_ids == labels, logits, 0.0),
                         axis=-1, keepdims=True)                       # (T, 1)
        valid = (labels != IGNORE_INDEX).astype(jnp.float32)           # (T, 1)
        per_tok = (lse - picked) * valid
        num = jnp.sum(per_tok, axis=0, keepdims=True)                  # (1, 1)
        den = jnp.maximum(jnp.sum(valid, axis=0, keepdims=True), 1.0)  # (1, 1)
        loss = num / den                                               # exact divide
        loss_ref[0, 0] = loss[0, 0]                                    # scalar -> SMEM


# ---------------- pallas_call wrapper -----------------------------------------
def _resident_spec(shape):
    n = len(shape)
    return pl.BlockSpec(shape, lambda l, n=n: (0,) * n)


def _layer_spec(shape):
    n = len(shape)
    return pl.BlockSpec((None, *shape), lambda l, n=n: (l, *((0,) * n)))


def _fused_forward_call(emb2d, add_mask, labels2d, params):
    args = (emb2d, add_mask, labels2d,
            params["emb_ln_g"], params["emb_ln_b"],
            params["wq"], params["bq"], params["wk"], params["bk"],
            params["wv"], params["bv"], params["wo"], params["bo"],
            params["ln1g"], params["ln1b"],
            params["w1"], params["b1"], params["w2"], params["b2"],
            params["ln2g"], params["ln2b"],
            params["cls_w"], params["cls_b"])

    matmul_flops = NUM_LAYERS * (
        2 * T * H * H * 4                    # q, k, v, o projections
        + 2 * B * NH * S * S * DH * 2        # scores + PV
        + 2 * T * H * FF * 2                 # FFN up + down
    ) + 2 * T * H * VOCAB                    # classifier
    cost = pl.CostEstimate(
        flops=int(matmul_flops),
        transcendentals=int(NUM_LAYERS * (B * NH * S * S + T * FF) + T * VOCAB),
        bytes_accessed=int(sum(int(x.size) * x.dtype.itemsize for x in args)
                           + T * VOCAB * 4 + 4),
    )

    grid_spec = pltpu.PrefetchScalarGridSpec(
        num_scalar_prefetch=0,
        grid=(NUM_LAYERS,),
        in_specs=[
            _resident_spec((T, H)),            # embeddings
            _resident_spec((B, 1, S)),         # additive attention mask
            _resident_spec((T, 1)),            # labels
            _resident_spec((1, H)),            # emb LN gamma
            _resident_spec((1, H)),            # emb LN beta
            _layer_spec((H, H)), _layer_spec((1, H)),     # wq, bq
            _layer_spec((H, H)), _layer_spec((1, H)),     # wk, bk
            _layer_spec((H, H)), _layer_spec((1, H)),     # wv, bv
            _layer_spec((H, H)), _layer_spec((1, H)),     # wo, bo
            _layer_spec((1, H)), _layer_spec((1, H)),     # ln1 gamma/beta
            _layer_spec((H, FF)), _layer_spec((1, FF)),   # w1, b1
            _layer_spec((FF, H)), _layer_spec((1, H)),    # w2, b2
            _layer_spec((1, H)), _layer_spec((1, H)),     # ln2 gamma/beta
            _resident_spec((H, VOCAB)),        # classifier weight
            _resident_spec((1, VOCAB)),        # classifier bias
        ],
        out_specs=[
            pl.BlockSpec((T, VOCAB), lambda l: (0, 0)),              # logits (VMEM)
            pl.BlockSpec(memory_space=pltpu.MemorySpace.SMEM),       # scalar loss
        ],
        scratch_shapes=[
            pltpu.VMEM((T, H), jnp.float32),   # hidden state carried across layers
            pltpu.VMEM((T, H), jnp.float32),   # per-layer attention context assembly
        ],
    )

    return pl.pallas_call(
        _encoder_kernel,
        out_shape=(jax.ShapeDtypeStruct((T, VOCAB), jnp.float32),
                   jax.ShapeDtypeStruct((1, 1), jnp.float32)),
        grid_spec=grid_spec,
        compiler_params=pltpu.CompilerParams(dimension_semantics=("arbitrary",)),
        cost_estimate=cost,
    )(*args)


# ---------------- model glue (plain JAX) --------------------------------------
def init_params(key):
    def nrm(k, shape, dtype=jnp.float32, scale=0.02):
        return (scale * jax.random.normal(k, shape, dtype=jnp.float32)).astype(dtype)

    keys = iter(jax.random.split(key, 16))
    L = NUM_LAYERS
    bf = jnp.bfloat16
    return {
        # embeddings (gather stays in plain JAX)
        "word_emb": nrm(next(keys), (VOCAB, H)),
        "pos_emb": nrm(next(keys), (S, H)),
        "type_emb": nrm(next(keys), (2, H)),
        "emb_ln_g": jnp.ones((1, H), jnp.float32),
        "emb_ln_b": jnp.zeros((1, H), jnp.float32),
        # encoder layers, stacked over the layer axis; matmul weights in bf16
        "wq": nrm(next(keys), (L, H, H), bf),
        "bq": jnp.zeros((L, 1, H), jnp.float32),
        "wk": nrm(next(keys), (L, H, H), bf),
        "bk": jnp.zeros((L, 1, H), jnp.float32),
        "wv": nrm(next(keys), (L, H, H), bf),
        "bv": jnp.zeros((L, 1, H), jnp.float32),
        "wo": nrm(next(keys), (L, H, H), bf),
        "bo": jnp.zeros((L, 1, H), jnp.float32),
        "ln1g": jnp.ones((L, 1, H), jnp.float32),
        "ln1b": jnp.zeros((L, 1, H), jnp.float32),
        "w1": nrm(next(keys), (L, H, FF), bf),
        "b1": jnp.zeros((L, 1, FF), jnp.float32),
        "w2": nrm(next(keys), (L, FF, H), bf),
        "b2": jnp.zeros((L, 1, H), jnp.float32),
        "ln2g": jnp.ones((L, 1, H), jnp.float32),
        "ln2b": jnp.zeros((L, 1, H), jnp.float32),
        # token classification / MLM head
        "cls_w": nrm(next(keys), (H, VOCAB), bf),
        "cls_b": jnp.zeros((1, VOCAB), jnp.float32),
    }


def uhc_bert_forward(params, input_ids, attention_mask=None,
                     token_type_ids=None, labels=None):
    """Mirrors UHCBert.forward: returns (loss, logits)."""
    if attention_mask is None:
        attention_mask = jnp.ones_like(input_ids)
    if token_type_ids is None:
        token_type_ids = jnp.zeros_like(input_ids)

    # Embedding lookup (gather) kept in plain JAX; result fed to the fused kernel.
    pos_ids = jnp.arange(S, dtype=jnp.int32)[None, :]
    emb = (jnp.take(params["word_emb"], input_ids, axis=0)
           + jnp.take(params["pos_emb"], pos_ids, axis=0)
           + jnp.take(params["type_emb"], token_type_ids, axis=0)).astype(jnp.float32)
    emb2d = emb.reshape(T, H)

    # layer-invariant additive key mask, computed once
    add_mask = (1.0 - attention_mask.astype(jnp.float32)).reshape(B, 1, S) * NEG_INF

    have_labels = labels is not None
    if have_labels:
        labels2d = labels.reshape(T, 1).astype(jnp.int32)
    else:
        labels2d = jnp.full((T, 1), IGNORE_INDEX, dtype=jnp.int32)

    logits2d, loss = _fused_forward_call(emb2d, add_mask, labels2d, params)
    logits = logits2d.reshape(B, S, VOCAB)
    if not have_labels:
        return 0.0, logits
    return loss[0, 0], logits


# ---------------- main ---------------------------------------------------------
if __name__ == "__main__":
    key = jax.random.PRNGKey(0)
    k_param, k_ids, k_lab = jax.random.split(key, 3)

    params = init_params(k_param)

    input_ids = jax.random.randint(k_ids, (B, S), 0, VOCAB, dtype=jnp.int32)
    token_type_ids = jnp.zeros((B, S), dtype=jnp.int32)
    attention_mask = jnp.ones((B, S), dtype=jnp.int32).at[1, -2:].set(0)  # pad tail of batch 1
    labels = jax.random.randint(k_lab, (B, S), 0, VOCAB, dtype=jnp.int32)
    labels = labels.at[0, 0].set(IGNORE_INDEX).at[1, -1].set(IGNORE_INDEX)  # MLM-style ignored tokens

    forward = jax.jit(uhc_bert_forward)
    loss, logits = forward(params, input_ids, attention_mask, token_type_ids, labels)
    loss = jax.block_until_ready(loss)
    logits = jax.block_until_ready(logits)

    assert logits.shape == (B, S, VOCAB)
    assert bool(jnp.isfinite(loss)) and bool(jnp.all(jnp.isfinite(logits)))
    print("KERNEL_OK")
</pallas_src>

<mosaic_0001>
module attributes {stable_mosaic.version = 11 : i64} {
  func.func @_encoder_kernel(%arg0: i32, %arg1: memref<16x32xf32, #tpu.memory_space<vmem>>, %arg2: memref<2x1x8xf32, #tpu.memory_space<vmem>>, %arg3: memref<16x1xi32, #tpu.memory_space<vmem>>, %arg4: memref<1x32xf32, #tpu.memory_space<vmem>>, %arg5: memref<1x32xf32, #tpu.memory_space<vmem>>, %arg6: memref<1x32x32xbf16, #tpu.memory_space<vmem>>, %arg7: memref<1x1x32xf32, #tpu.memory_space<vmem>>, %arg8: memref<1x32x32xbf16, #tpu.memory_space<vmem>>, %arg9: memref<1x1x32xf32, #tpu.memory_space<vmem>>, %arg10: memref<1x32x32xbf16, #tpu.memory_space<vmem>>, %arg11: memref<1x1x32xf32, #tpu.memory_space<vmem>>, %arg12: memref<1x32x32xbf16, #tpu.memory_space<vmem>>, %arg13: memref<1x1x32xf32, #tpu.memory_space<vmem>>, %arg14: memref<1x1x32xf32, #tpu.memory_space<vmem>>, %arg15: memref<1x1x32xf32, #tpu.memory_space<vmem>>, %arg16: memref<1x32x64xbf16, #tpu.memory_space<vmem>>, %arg17: memref<1x1x64xf32, #tpu.memory_space<vmem>>, %arg18: memref<1x64x32xbf16, #tpu.memory_space<vmem>>, %arg19: memref<1x1x32xf32, #tpu.memory_space<vmem>>, %arg20: memref<1x1x32xf32, #tpu.memory_space<vmem>>, %arg21: memref<1x1x32xf32, #tpu.memory_space<vmem>>, %arg22: memref<32x128xbf16, #tpu.memory_space<vmem>>, %arg23: memref<1x128xf32, #tpu.memory_space<vmem>>, %arg24: memref<16x128xf32, #tpu.memory_space<vmem>>, %arg25: memref<1x1xf32, #tpu.memory_space<smem>>, %arg26: memref<16x32xf32, #tpu.memory_space<vmem>>, %arg27: memref<16x32xf32, #tpu.memory_space<vmem>>) attributes {dimension_semantics = [#tpu.dimension_semantics<arbitrary>], iteration_bounds = array<i64: 2>, scalar_prefetch = 0 : i64, scratch_operands = 2 : i64, tpu.core_type = #tpu.core_type<tc>, window_params = [{pipeline_mode = #tpu.pipeline_mode<synchronous>, transform_indices = @transform_0, window_bounds = array<i64: 16, 32>}, {pipeline_mode = #tpu.pipeline_mode<synchronous>, transform_indices = @transform_1, window_bounds = array<i64: 2, 1, 8>}, {pipeline_mode = #tpu.pipeline_mode<synchronous>, transform_indices = @transform_2, window_bounds = array<i64: 16, 1>}, {pipeline_mode = #tpu.pipeline_mode<synchronous>, transform_indices = @transform_3, window_bounds = array<i64: 1, 32>}, {pipeline_mode = #tpu.pipeline_mode<synchronous>, transform_indices = @transform_4, window_bounds = array<i64: 1, 32>}, {transform_indices = @transform_5, window_bounds = array<i64: 1, 32, 32>}, {transform_indices = @transform_6, window_bounds = array<i64: 1, 1, 32>}, {transform_indices = @transform_7, window_bounds = array<i64: 1, 32, 32>}, {transform_indices = @transform_8, window_bounds = array<i64: 1, 1, 32>}, {transform_indices = @transform_9, window_bounds = array<i64: 1, 32, 32>}, {transform_indices = @transform_10, window_bounds = array<i64: 1, 1, 32>}, {transform_indices = @transform_11, window_bounds = array<i64: 1, 32, 32>}, {transform_indices = @transform_12, window_bounds = array<i64: 1, 1, 32>}, {transform_indices = @transform_13, window_bounds = array<i64: 1, 1, 32>}, {transform_indices = @transform_14, window_bounds = array<i64: 1, 1, 32>}, {transform_indices = @transform_15, window_bounds = array<i64: 1, 32, 64>}, {transform_indices = @transform_16, window_bounds = array<i64: 1, 1, 64>}, {transform_indices = @transform_17, window_bounds = array<i64: 1, 64, 32>}, {transform_indices = @transform_18, window_bounds = array<i64: 1, 1, 32>}, {transform_indices = @transform_19, window_bounds = array<i64: 1, 1, 32>}, {transform_indices = @transform_20, window_bounds = array<i64: 1, 1, 32>}, {pipeline_mode = #tpu.pipeline_mode<synchronous>, transform_indices = @transform_21, window_bounds = array<i64: 32, 128>}, {pipeline_mode = #tpu.pipeline_mode<synchronous>, transform_indices = @transform_22, window_bounds = array<i64: 1, 128>}, {pipeline_mode = #tpu.pipeline_mode<synchronous>, transform_indices = @transform_23, window_bounds = array<i64: 16, 128>}, {transform_indices = @transform_24, window_bounds = array<i64: 1, 1>}]} {
    %c0_i32 = arith.constant 0 : i32
    %0 = arith.cmpi eq, %arg0, %c0_i32 : i32
    %1 = arith.extui %0 : i1 to i32
    %c0_i32_0 = arith.constant 0 : i32
    %2 = arith.cmpi ne, %1, %c0_i32_0 : i32
    scf.if %2 {
      %c0_143 = arith.constant 0 : index
      %c0_144 = arith.constant 0 : index
      %321 = vector.load %arg1[%c0_143, %c0_144] : memref<16x32xf32, #tpu.memory_space<vmem>>, vector<16x32xf32>
      %c0_145 = arith.constant 0 : index
      %c0_146 = arith.constant 0 : index
      %322 = vector.load %arg4[%c0_145, %c0_146] : memref<1x32xf32, #tpu.memory_space<vmem>>, vector<1x32xf32>
      %c0_147 = arith.constant 0 : index
      %c0_148 = arith.constant 0 : index
      %323 = vector.load %arg5[%c0_147, %c0_148] : memref<1x32xf32, #tpu.memory_space<vmem>>, vector<1x32xf32>
      %cst_149 = arith.constant dense<0.000000e+00> : vector<16xf32>
      %324 = vector.multi_reduction <add>, %321, %cst_149 [1] : vector<16x32xf32> to vector<16xf32>
      %325 = vector.shape_cast %324 : vector<16xf32> to vector<16x1xf32>
      %cst_150 = arith.constant 3.200000e+01 : f32
      %326 = vector.broadcast %cst_150 : f32 to vector<16x1xf32>
      %327 = arith.divf %325, %326 : vector<16x1xf32>
      %328 = vector.broadcast %327 : vector<16x1xf32> to vector<16x32xf32>
      %329 = arith.subf %321, %328 : vector<16x32xf32>
      %330 = arith.mulf %329, %329 : vector<16x32xf32>
      %cst_151 = arith.constant dense<0.000000e+00> : vector<16xf32>
      %331 = vector.multi_reduction <add>, %330, %cst_151 [1] : vector<16x32xf32> to vector<16xf32>
      %332 = vector.shape_cast %331 : vector<16xf32> to vector<16x1xf32>
      %cst_152 = arith.constant 3.200000e+01 : f32
      %333 = vector.broadcast %cst_152 : f32 to vector<16x1xf32>
      %334 = arith.divf %332, %333 : vector<16x1xf32>
      %335 = vector.broadcast %327 : vector<16x1xf32> to vector<16x32xf32>
      %336 = arith.subf %321, %335 : vector<16x32xf32>
      %cst_153 = arith.constant 9.99999996E-13 : f32
      %337 = vector.broadcast %cst_153 : f32 to vector<16x1xf32>
      %338 = arith.addf %334, %337 : vector<16x1xf32>
      %339 = math.rsqrt %338 : vector<16x1xf32>
      %340 = vector.broadcast %339 : vector<16x1xf32> to vector<16x32xf32>
      %341 = arith.mulf %336, %340 : vector<16x32xf32>
      %342 = vector.broadcast %322 : vector<1x32xf32> to vector<16x32xf32>
      %343 = arith.mulf %341, %342 : vector<16x32xf32>
      %344 = vector.broadcast %323 : vector<1x32xf32> to vector<16x32xf32>
      %345 = arith.addf %343, %344 : vector<16x32xf32>
      %c0_154 = arith.constant 0 : index
      %c0_155 = arith.constant 0 : index
      %346 = vector.load %arg26[%c0_154, %c0_155] : memref<16x32xf32, #tpu.memory_space<vmem>>, vector<16x32xf32>
      tpu.vector_store %arg26[%c0_154, %c0_155], %345 {strides = array<i32>} : memref<16x32xf32, #tpu.memory_space<vmem>>, vector<16x32xf32>,
    } else {
    }
    %c0 = arith.constant 0 : index
    %c0_1 = arith.constant 0 : index
    %3 = vector.load %arg26[%c0, %c0_1] : memref<16x32xf32, #tpu.memory_space<vmem>>, vector<16x32xf32>
    %4 = arith.truncf %3 : vector<16x32xf32> to vector<16x32xbf16>
    %c0_2 = arith.constant 0 : index
    %c0_3 = arith.constant 0 : index
    %c0_4 = arith.constant 0 : index
    %5 = vector.load %arg6[%c0_2, %c0_3, %c0_4] : memref<1x32x32xbf16, #tpu.memory_space<vmem>>, vector<1x32x32xbf16>
    %6 = vector.shape_cast %5 : vector<1x32x32xbf16> to vector<32x32xbf16>
    %cst = arith.constant dense<0.000000e+00> : vector<16x32xf32>
    %7 = tpu.matmul %4, %6, %cst {dimension_numbers = #tpu.dot_dimension_numbers<[1], [0], [0], [1], [0, 0, 1, 1], [], []>} : vector<16x32xbf16>, vector<32x32xbf16>, vector<16x32xf32> -> vector<16x32xf32>
    %c0_5 = arith.constant 0 : index
    %c0_6 = arith.constant 0 : index
    %c0_7 = arith.constant 0 : index
    %8 = vector.load %arg7[%c0_5, %c0_6, %c0_7] : memref<1x1x32xf32, #tpu.memory_space<vmem>>, vector<1x1x32xf32>
    %9 = vector.shape_cast %8 : vector<1x1x32xf32> to vector<1x32xf32>
    %10 = vector.broadcast %9 : vector<1x32xf32> to vector<16x32xf32>
    %11 = arith.addf %7, %10 : vector<16x32xf32>
    %c0_8 = arith.constant 0 : index
    %c0_9 = arith.constant 0 : index
    %c0_10 = arith.constant 0 : index
    %12 = vector.load %arg8[%c0_8, %c0_9, %c0_10] : memref<1x32x32xbf16, #tpu.memory_space<vmem>>, vector<1x32x32xbf16>
    %13 = vector.shape_cast %12 : vector<1x32x32xbf16> to vector<32x32xbf16>
    %cst_11 = arith.constant dense<0.000000e+00> : vector<16x32xf32>
    %14 = tpu.matmul %4, %13, %cst_11 {dimension_numbers = #tpu.dot_dimension_numbers<[1], [0], [0], [1], [0, 0, 1, 1], [], []>} : vector<16x32xbf16>, vector<32x32xbf16>, vector<16x32xf32> -> vector<16x32xf32>
    %c0_12 = arith.constant 0 : index
    %c0_13 = arith.constant 0 : index
    %c0_14 = arith.constant 0 : index
    %15 = vector.load %arg9[%c0_12, %c0_13, %c0_14] : memref<1x1x32xf32, #tpu.memory_space<vmem>>, vector<1x1x32xf32>
    %16 = vector.shape_cast %15 : vector<1x1x32xf32> to vector<1x32xf32>
    %17 = vector.broadcast %16 : vector<1x32xf32> to vector<16x32xf32>
    %18 = arith.addf %14, %17 : vector<16x32xf32>
    %c0_15 = arith.constant 0 : index
    %c0_16 = arith.constant 0 : index
    %c0_17 = arith.constant 0 : index
    %19 = vector.load %arg10[%c0_15, %c0_16, %c0_17] : memref<1x32x32xbf16, #tpu.memory_space<vmem>>, vector<1x32x32xbf16>
    %20 = vector.shape_cast %19 : vector<1x32x32xbf16> to vector<32x32xbf16>
    %cst_18 = arith.constant dense<0.000000e+00> : vector<16x32xf32>
    %21 = tpu.matmul %4, %20, %cst_18 {dimension_numbers = #tpu.dot_dimension_numbers<[1], [0], [0], [1], [0, 0, 1, 1], [], []>} : vector<16x32xbf16>, vector<32x32xbf16>, vector<16x32xf32> -> vector<16x32xf32>
    %c0_19 = arith.constant 0 : index
    %c0_20 = arith.constant 0 : index
    %c0_21 = arith.constant 0 : index
    %22 = vector.load %arg11[%c0_19, %c0_20, %c0_21] : memref<1x1x32xf32, #tpu.memory_space<vmem>>, vector<1x1x32xf32>
    %23 = vector.shape_cast %22 : vector<1x1x32xf32> to vector<1x32xf32>
    %24 = vector.broadcast %23 : vector<1x32xf32> to vector<16x32xf32>
    %25 = arith.addf %21, %24 : vector<16x32xf32>
    %26 = vector.extract_strided_slice %11 {offsets = [0, 0], sizes = [8, 32], strides = [1, 1]} : vector<16x32xf32> to vector<8x32xf32>
    %27 = vector.extract_strided_slice %18 {offsets = [0, 0], sizes = [8, 32], strides = [1, 1]} : vector<16x32xf32> to vector<8x32xf32>
    %28 = tpu.transpose %27, [1, 0] : vector<8x32xf32> -> vector<32x8xf32>
    %29 = vector.extract_strided_slice %25 {offsets = [0, 0], sizes = [8, 32], strides = [1, 1]} : vector<16x32xf32> to vector<8x32xf32>
    %c0_22 = arith.constant 0 : index
    %c0_23 = arith.constant 0 : index
    %c0_24 = arith.constant 0 : index
    %30 = vector.load %arg2[%c0_22, %c0_23, %c0_24] : memref<2x1x8xf32, #tpu.memory_space<vmem>>, vector<1x1x8xf32>
    %31 = vector.shape_cast %30 : vector<1x1x8xf32> to vector<1x8xf32>
    %32 = vector.extract_strided_slice %26 {offsets = [0, 0], sizes = [8, 8], strides = [1, 1]} : vector<8x32xf32> to vector<8x8xf32>
    %33 = vector.extract_strided_slice %28 {offsets = [0, 0], sizes = [8, 8], strides = [1, 1]} : vector<32x8xf32> to vector<8x8xf32>
    %cst_25 = arith.constant dense<0.000000e+00> : vector<8x8xf32>
    %34 = tpu.matmul %32, %33, %cst_25 {dimension_numbers = #tpu.dot_dimension_numbers<[1], [0], [0], [1], [0, 0, 1, 1], [], []>} : vector<8x8xf32>, vector<8x8xf32>, vector<8x8xf32> -> vector<8x8xf32>
    %cst_26 = arith.constant 0.353553385 : f32
    %35 = vector.broadcast %cst_26 : f32 to vector<8x8xf32>
    %36 = arith.mulf %34, %35 : vector<8x8xf32>
    %37 = vector.broadcast %31 : vector<1x8xf32> to vector<8x8xf32>
    %38 = arith.addf %36, %37 : vector<8x8xf32>
    %cst_27 = arith.constant dense<0xFF800000> : vector<8xf32>
    %39 = vector.multi_reduction <maximumf>, %38, %cst_27 [1] : vector<8x8xf32> to vector<8xf32>
    %40 = vector.shape_cast %39 : vector<8xf32> to vector<8x1xf32>
    %41 = vector.broadcast %40 : vector<8x1xf32> to vector<8x8xf32>
    %42 = arith.subf %38, %41 : vector<8x8xf32>
    %43 = math.exp %42 : vector<8x8xf32>
    %cst_28 = arith.constant dense<0.000000e+00> : vector<8xf32>
    %44 = vector.multi_reduction <add>, %43, %cst_28 [1] : vector<8x8xf32> to vector<8xf32>
    %45 = vector.shape_cast %44 : vector<8xf32> to vector<8x1xf32>
    %46 = tpu.reciprocal %45 {approx = true} : vector<8x1xf32> -> vector<8x1xf32>
    %47 = vector.broadcast %46 : vector<8x1xf32> to vector<8x8xf32>
    %48 = arith.mulf %43, %47 : vector<8x8xf32>
    %49 = vector.extract_strided_slice %29 {offsets = [0, 0], sizes = [8, 8], strides = [1, 1]} : vector<8x32xf32> to vector<8x8xf32>
    %cst_29 = arith.constant dense<0.000000e+00> : vector<8x8xf32>
    %50 = tpu.matmul %48, %49, %cst_29 {dimension_numbers = #tpu.dot_dimension_numbers<[1], [0], [0], [1], [0, 0, 1, 1], [], []>} : vector<8x8xf32>, vector<8x8xf32>, vector<8x8xf32> -> vector<8x8xf32>
    %c0_30 = arith.constant 0 : index
    %c0_31 = arith.constant 0 : index
    %51 = vector.load %arg27[%c0_30, %c0_31] : memref<16x32xf32, #tpu.memory_space<vmem>>, vector<8x8xf32>
    tpu.vector_store %arg27[%c0_30, %c0_31], %50 {strides = array<i32>} : memref<16x32xf32, #tpu.memory_space<vmem>>, vector<8x8xf32>,
    %52 = vector.extract_strided_slice %26 {offsets = [0, 8], sizes = [8, 8], strides = [1, 1]} : vector<8x32xf32> to vector<8x8xf32>
    %53 = vector.extract_strided_slice %28 {offsets = [8, 0], sizes = [8, 8], strides = [1, 1]} : vector<32x8xf32> to vector<8x8xf32>
    %cst_32 = arith.constant dense<0.000000e+00> : vector<8x8xf32>
    %54 = tpu.matmul %52, %53, %cst_32 {dimension_numbers = #tpu.dot_dimension_numbers<[1], [0], [0], [1], [0, 0, 1, 1], [], []>} : vector<8x8xf32>, vector<8x8xf32>, vector<8x8xf32> -> vector<8x8xf32>
    %cst_33 = arith.constant 0.353553385 : f32
    %55 = vector.broadcast %cst_33 : f32 to vector<8x8xf32>
    %56 = arith.mulf %54, %55 : vector<8x8xf32>
    %57 = vector.broadcast %31 : vector<1x8xf32> to vector<8x8xf32>
    %58 = arith.addf %56, %57 : vector<8x8xf32>
    %cst_34 = arith.constant dense<0xFF800000> : vector<8xf32>
    %59 = vector.multi_reduction <maximumf>, %58, %cst_34 [1] : vector<8x8xf32> to vector<8xf32>
    %60 = vector.shape_cast %59 : vector<8xf32> to vector<8x1xf32>
    %61 = vector.broadcast %60 : vector<8x1xf32> to vector<8x8xf32>
    %62 = arith.subf %58, %61 : vector<8x8xf32>
    %63 = math.exp %62 : vector<8x8xf32>
    %cst_35 = arith.constant dense<0.000000e+00> : vector<8xf32>
    %64 = vector.multi_reduction <add>, %63, %cst_35 [1] : vector<8x8xf32> to vector<8xf32>
    %65 = vector.shape_cast %64 : vector<8xf32> to vector<8x1xf32>
    %66 = tpu.reciprocal %65 {approx = true} : vector<8x1xf32> -> vector<8x1xf32>
    %67 = vector.broadcast %66 : vector<8x1xf32> to vector<8x8xf32>
    %68 = arith.mulf %63, %67 : vector<8x8xf32>
    %69 = vector.extract_strided_slice %29 {offsets = [0, 8], sizes = [8, 8], strides = [1, 1]} : vector<8x32xf32> to vector<8x8xf32>
    %cst_36 = arith.constant dense<0.000000e+00> : vector<8x8xf32>
    %70 = tpu.matmul %68, %69, %cst_36 {dimension_numbers = #tpu.dot_dimension_numbers<[1], [0], [0], [1], [0, 0, 1, 1], [], []>} : vector<8x8xf32>, vector<8x8xf32>, vector<8x8xf32> -> vector<8x8xf32>
    %c0_37 = arith.constant 0 : index
    %c8 = arith.constant 8 : index
    %71 = vector.load %arg27[%c0_37, %c8] : memref<16x32xf32, #tpu.memory_space<vmem>>, vector<8x8xf32>
    tpu.vector_store %arg27[%c0_37, %c8], %70 {strides = array<i32>} : memref<16x32xf32, #tpu.memory_space<vmem>>, vector<8x8xf32>,
    %72 = vector.extract_strided_slice %26 {offsets = [0, 16], sizes = [8, 8], strides = [1, 1]} : vector<8x32xf32> to vector<8x8xf32>
    %73 = vector.extract_strided_slice %28 {offsets = [16, 0], sizes = [8, 8], strides = [1, 1]} : vector<32x8xf32> to vector<8x8xf32>
    %cst_38 = arith.constant dense<0.000000e+00> : vector<8x8xf32>
    %74 = tpu.matmul %72, %73, %cst_38 {dimension_numbers = #tpu.dot_dimension_numbers<[1], [0], [0], [1], [0, 0, 1, 1], [], []>} : vector<8x8xf32>, vector<8x8xf32>, vector<8x8xf32> -> vector<8x8xf32>
    %cst_39 = arith.constant 0.353553385 : f32
    %75 = vector.broadcast %cst_39 : f32 to vector<8x8xf32>
    %76 = arith.mulf %74, %75 : vector<8x8xf32>
    %77 = vector.broadcast %31 : vector<1x8xf32> to vector<8x8xf32>
    %78 = arith.addf %76, %77 : vector<8x8xf32>
    %cst_40 = arith.constant dense<0xFF800000> : vector<8xf32>
    %79 = vector.multi_reduction <maximumf>, %78, %cst_40 [1] : vector<8x8xf32> to vector<8xf32>
    %80 = vector.shape_cast %79 : vector<8xf32> to vector<8x1xf32>
    %81 = vector.broadcast %80 : vector<8x1xf32> to vector<8x8xf32>
    %82 = arith.subf %78, %81 : vector<8x8xf32>
    %83 = math.exp %82 : vector<8x8xf32>
    %cst_41 = arith.constant dense<0.000000e+00> : vector<8xf32>
    %84 = vector.multi_reduction <add>, %83, %cst_41 [1] : vector<8x8xf32> to vector<8xf32>
    %85 = vector.shape_cast %84 : vector<8xf32> to vector<8x1xf32>
    %86 = tpu.reciprocal %85 {approx = true} : vector<8x1xf32> -> vector<8x1xf32>
    %87 = vector.broadcast %86 : vector<8x1xf32> to vector<8x8xf32>
    %88 = arith.mulf %83, %87 : vector<8x8xf32>
    %89 = vector.extract_strided_slice %29 {offsets = [0, 16], sizes = [8, 8], strides = [1, 1]} : vector<8x32xf32> to vector<8x8xf32>
    %cst_42 = arith.constant dense<0.000000e+00> : vector<8x8xf32>
    %90 = tpu.matmul %88, %89, %cst_42 {dimension_numbers = #tpu.dot_dimension_numbers<[1], [0], [0], [1], [0, 0, 1, 1], [], []>} : vector<8x8xf32>, vector<8x8xf32>, vector<8x8xf32> -> vector<8x8xf32>
    %c0_43 = arith.constant 0 : index
    %c16 = arith.constant 16 : index
    %91 = vector.load %arg27[%c0_43, %c16] : memref<16x32xf32, #tpu.memory_space<vmem>>, vector<8x8xf32>
    tpu.vector_store %arg27[%c0_43, %c16], %90 {strides = array<i32>} : memref<16x32xf32, #tpu.memory_space<vmem>>, vector<8x8xf32>,
    %92 = vector.extract_strided_slice %26 {offsets = [0, 24], sizes = [8, 8], strides = [1, 1]} : vector<8x32xf32> to vector<8x8xf32>
    %93 = vector.extract_strided_slice %28 {offsets = [24, 0], sizes = [8, 8], strides = [1, 1]} : vector<32x8xf32> to vector<8x8xf32>
    %cst_44 = arith.constant dense<0.000000e+00> : vector<8x8xf32>
    %94 = tpu.matmul %92, %93, %cst_44 {dimension_numbers = #tpu.dot_dimension_numbers<[1], [0], [0], [1], [0, 0, 1, 1], [], []>} : vector<8x8xf32>, vector<8x8xf32>, vector<8x8xf32> -> vector<8x8xf32>
    %cst_45 = arith.constant 0.353553385 : f32
    %95 = vector.broadcast %cst_45 : f32 to vector<8x8xf32>
    %96 = arith.mulf %94, %95 : vector<8x8xf32>
    %97 = vector.broadcast %31 : vector<1x8xf32> to vector<8x8xf32>
    %98 = arith.addf %96, %97 : vector<8x8xf32>
    %cst_46 = arith.constant dense<0xFF800000> : vector<8xf32>
    %99 = vector.multi_reduction <maximumf>, %98, %cst_46 [1] : vector<8x8xf32> to vector<8xf32>
    %100 = vector.shape_cast %99 : vector<8xf32> to vector<8x1xf32>
    %101 = vector.broadcast %100 : vector<8x1xf32> to vector<8x8xf32>
    %102 = arith.subf %98, %101 : vector<8x8xf32>
    %103 = math.exp %102 : vector<8x8xf32>
    %cst_47 = arith.constant dense<0.000000e+00> : vector<8xf32>
    %104 = vector.multi_reduction <add>, %103, %cst_47 [1] : vector<8x8xf32> to vector<8xf32>
    %105 = vector.shape_cast %104 : vector<8xf32> to vector<8x1xf32>
    %106 = tpu.reciprocal %105 {approx = true} : vector<8x1xf32> -> vector<8x1xf32>
    %107 = vector.broadcast %106 : vector<8x1xf32> to vector<8x8xf32>
    %108 = arith.mulf %103, %107 : vector<8x8xf32>
    %109 = vector.extract_strided_slice %29 {offsets = [0, 24], sizes = [8, 8], strides = [1, 1]} : vector<8x32xf32> to vector<8x8xf32>
    %cst_48 = arith.constant dense<0.000000e+00> : vector<8x8xf32>
    %110 = tpu.matmul %108, %109, %cst_48 {dimension_numbers = #tpu.dot_dimension_numbers<[1], [0], [0], [1], [0, 0, 1, 1], [], []>} : vector<8x8xf32>, vector<8x8xf32>, vector<8x8xf32> -> vector<8x8xf32>
    %c0_49 = arith.constant 0 : index
    %c24 = arith.constant 24 : index
    %111 = vector.load %arg27[%c0_49, %c24] : memref<16x32xf32, #tpu.memory_space<vmem>>, vector<8x8xf32>
    tpu.vector_store %arg27[%c0_49, %c24], %110 {strides = array<i32>} : memref<16x32xf32, #tpu.memory_space<vmem>>, vector<8x8xf32>,
    %112 = vector.extract_strided_slice %11 {offsets = [8, 0], sizes = [8, 32], strides = [1, 1]} : vector<16x32xf32> to vector<8x32xf32>
    %113 = vector.extract_strided_slice %18 {offsets = [8, 0], sizes = [8, 32], strides = [1, 1]} : vector<16x32xf32> to vector<8x32xf32>
    %114 = tpu.transpose %113, [1, 0] : vector<8x32xf32> -> vector<32x8xf32>
    %115 = vector.extract_strided_slice %25 {offsets = [8, 0], sizes = [8, 32], strides = [1, 1]} : vector<16x32xf32> to vector<8x32xf32>
    %c1 = arith.constant 1 : index
    %c0_50 = arith.constant 0 : index
    %c0_51 = arith.constant 0 : index
    %116 = vector.load %arg2[%c1, %c0_50, %c0_51] : memref<2x1x8xf32, #tpu.memory_space<vmem>>, vector<1x1x8xf32>
    %117 = vector.shape_cast %116 : vector<1x1x8xf32> to vector<1x8xf32>
    %118 = vector.extract_strided_slice %112 {offsets = [0, 0], sizes = [8, 8], strides = [1, 1]} : vector<8x32xf32> to vector<8x8xf32>
    %119 = vector.extract_strided_slice %114 {offsets = [0, 0], sizes = [8, 8], strides = [1, 1]} : vector<32x8xf32> to vector<8x8xf32>
    %cst_52 = arith.constant dense<0.000000e+00> : vector<8x8xf32>
    %120 = tpu.matmul %118, %119, %cst_52 {dimension_numbers = #tpu.dot_dimension_numbers<[1], [0], [0], [1], [0, 0, 1, 1], [], []>} : vector<8x8xf32>, vector<8x8xf32>, vector<8x8xf32> -> vector<8x8xf32>
    %cst_53 = arith.constant 0.353553385 : f32
    %121 = vector.broadcast %cst_53 : f32 to vector<8x8xf32>
    %122 = arith.mulf %120, %121 : vector<8x8xf32>
    %123 = vector.broadcast %117 : vector<1x8xf32> to vector<8x8xf32>
    %124 = arith.addf %122, %123 : vector<8x8xf32>
    %cst_54 = arith.constant dense<0xFF800000> : vector<8xf32>
    %125 = vector.multi_reduction <maximumf>, %124, %cst_54 [1] : vector<8x8xf32> to vector<8xf32>
    %126 = vector.shape_cast %125 : vector<8xf32> to vector<8x1xf32>
    %127 = vector.broadcast %126 : vector<8x1xf32> to vector<8x8xf32>
    %128 = arith.subf %124, %127 : vector<8x8xf32>
    %129 = math.exp %128 : vector<8x8xf32>
    %cst_55 = arith.constant dense<0.000000e+00> : vector<8xf32>
    %130 = vector.multi_reduction <add>, %129, %cst_55 [1] : vector<8x8xf32> to vector<8xf32>
    %131 = vector.shape_cast %130 : vector<8xf32> to vector<8x1xf32>
    %132 = tpu.reciprocal %131 {approx = true} : vector<8x1xf32> -> vector<8x1xf32>
    %133 = vector.broadcast %132 : vector<8x1xf32> to vector<8x8xf32>
    %134 = arith.mulf %129, %133 : vector<8x8xf32>
    %135 = vector.extract_strided_slice %115 {offsets = [0, 0], sizes = [8, 8], strides = [1, 1]} : vector<8x32xf32> to vector<8x8xf32>
    %cst_56 = arith.constant dense<0.000000e+00> : vector<8x8xf32>
    %136 = tpu.matmul %134, %135, %cst_56 {dimension_numbers = #tpu.dot_dimension_numbers<[1], [0], [0], [1], [0, 0, 1, 1], [], []>} : vector<8x8xf32>, vector<8x8xf32>, vector<8x8xf32> -> vector<8x8xf32>
    %c8_57 = arith.constant 8 : index
    %c0_58 = arith.constant 0 : index
    %137 = vector.load %arg27[%c8_57, %c0_58] : memref<16x32xf32, #tpu.memory_space<vmem>>, vector<8x8xf32>
    tpu.vector_store %arg27[%c8_57, %c0_58], %136 {strides = array<i32>} : memref<16x32xf32, #tpu.memory_space<vmem>>, vector<8x8xf32>,
    %138 = vector.extract_strided_slice %112 {offsets = [0, 8], sizes = [8, 8], strides = [1, 1]} : vector<8x32xf32> to vector<8x8xf32>
    %139 = vector.extract_strided_slice %114 {offsets = [8, 0], sizes = [8, 8], strides = [1, 1]} : vector<32x8xf32> to vector<8x8xf32>
    %cst_59 = arith.constant dense<0.000000e+00> : vector<8x8xf32>
    %140 = tpu.matmul %138, %139, %cst_59 {dimension_numbers = #tpu.dot_dimension_numbers<[1], [0], [0], [1], [0, 0, 1, 1], [], []>} : vector<8x8xf32>, vector<8x8xf32>, vector<8x8xf32> -> vector<8x8xf32>
    %cst_60 = arith.constant 0.353553385 : f32
    %141 = vector.broadcast %cst_60 : f32 to vector<8x8xf32>
    %142 = arith.mulf %140, %141 : vector<8x8xf32>
    %143 = vector.broadcast %117 : vector<1x8xf32> to vector<8x8xf32>
    %144 = arith.addf %142, %143 : vector<8x8xf32>
    %cst_61 = arith.constant dense<0xFF800000> : vector<8xf32>
    %145 = vector.multi_reduction <maximumf>, %144, %cst_61 [1] : vector<8x8xf32> to vector<8xf32>
    %146 = vector.shape_cast %145 : vector<8xf32> to vector<8x1xf32>
    %147 = vector.broadcast %146 : vector<8x1xf32> to vector<8x8xf32>
    %148 = arith.subf %144, %147 : vector<8x8xf32>
    %149 = math.exp %148 : vector<8x8xf32>
    %cst_62 = arith.constant dense<0.000000e+00> : vector<8xf32>
    %150 = vector.multi_reduction <add>, %149, %cst_62 [1] : vector<8x8xf32> to vector<8xf32>
    %151 = vector.shape_cast %150 : vector<8xf32> to vector<8x1xf32>
    %152 = tpu.reciprocal %151 {approx = true} : vector<8x1xf32> -> vector<8x1xf32>
    %153 = vector.broadcast %152 : vector<8x1xf32> to vector<8x8xf32>
    %154 = arith.mulf %149, %153 : vector<8x8xf32>
    %155 = vector.extract_strided_slice %115 {offsets = [0, 8], sizes = [8, 8], strides = [1, 1]} : vector<8x32xf32> to vector<8x8xf32>
    %cst_63 = arith.constant dense<0.000000e+00> : vector<8x8xf32>
    %156 = tpu.matmul %154, %155, %cst_63 {dimension_numbers = #tpu.dot_dimension_numbers<[1], [0], [0], [1], [0, 0, 1, 1], [], []>} : vector<8x8xf32>, vector<8x8xf32>, vector<8x8xf32> -> vector<8x8xf32>
    %c8_64 = arith.constant 8 : index
    %c8_65 = arith.constant 8 : index
    %157 = vector.load %arg27[%c8_64, %c8_65] : memref<16x32xf32, #tpu.memory_space<vmem>>, vector<8x8xf32>
    tpu.vector_store %arg27[%c8_64, %c8_65], %156 {strides = array<i32>} : memref<16x32xf32, #tpu.memory_space<vmem>>, vector<8x8xf32>,
    %158 = vector.extract_strided_slice %112 {offsets = [0, 16], sizes = [8, 8], strides = [1, 1]} : vector<8x32xf32> to vector<8x8xf32>
    %159 = vector.extract_strided_slice %114 {offsets = [16, 0], sizes = [8, 8], strides = [1, 1]} : vector<32x8xf32> to vector<8x8xf32>
    %cst_66 = arith.constant dense<0.000000e+00> : vector<8x8xf32>
    %160 = tpu.matmul %158, %159, %cst_66 {dimension_numbers = #tpu.dot_dimension_numbers<[1], [0], [0], [1], [0, 0, 1, 1], [], []>} : vector<8x8xf32>, vector<8x8xf32>, vector<8x8xf32> -> vector<8x8xf32>
    %cst_67 = arith.constant 0.353553385 : f32
    %161 = vector.broadcast %cst_67 : f32 to vector<8x8xf32>
    %162 = arith.mulf %160, %161 : vector<8x8xf32>
    %163 = vector.broadcast %117 : vector<1x8xf32> to vector<8x8xf32>
    %164 = arith.addf %162, %163 : vector<8x8xf32>
    %cst_68 = arith.constant dense<0xFF800000> : vector<8xf32>
    %165 = vector.multi_reduction <maximumf>, %164, %cst_68 [1] : vector<8x8xf32> to vector<8xf32>
    %166 = vector.shape_cast %165 : vector<8xf32> to vector<8x1xf32>
    %167 = vector.broadcast %166 : vector<8x1xf32> to vector<8x8xf32>
    %168 = arith.subf %164, %167 : vector<8x8xf32>
    %169 = math.exp %168 : vector<8x8xf32>
    %cst_69 = arith.constant dense<0.000000e+00> : vector<8xf32>
    %170 = vector.multi_reduction <add>, %169, %cst_69 [1] : vector<8x8xf32> to vector<8xf32>
    %171 = vector.shape_cast %170 : vector<8xf32> to vector<8x1xf32>
    %172 = tpu.reciprocal %171 {approx = true} : vector<8x1xf32> -> vector<8x1xf32>
    %173 = vector.broadcast %172 : vector<8x1xf32> to vector<8x8xf32>
    %174 = arith.mulf %169, %173 : vector<8x8xf32>
    %175 = vector.extract_strided_slice %115 {offsets = [0, 16], sizes = [8, 8], strides = [1, 1]} : vector<8x32xf32> to vector<8x8xf32>
    %cst_70 = arith.constant dense<0.000000e+00> : vector<8x8xf32>
    %176 = tpu.matmul %174, %175, %cst_70 {dimension_numbers = #tpu.dot_dimension_numbers<[1], [0], [0], [1], [0, 0, 1, 1], [], []>} : vector<8x8xf32>, vector<8x8xf32>, vector<8x8xf32> -> vector<8x8xf32>
    %c8_71 = arith.constant 8 : index
    %c16_72 = arith.constant 16 : index
    %177 = vector.load %arg27[%c8_71, %c16_72] : memref<16x32xf32, #tpu.memory_space<vmem>>, vector<8x8xf32>
    tpu.vector_store %arg27[%c8_71, %c16_72], %176 {strides = array<i32>} : memref<16x32xf32, #tpu.memory_space<vmem>>, vector<8x8xf32>,
    %178 = vector.extract_strided_slice %112 {offsets = [0, 24], sizes = [8, 8], strides = [1, 1]} : vector<8x32xf32> to vector<8x8xf32>
    %179 = vector.extract_strided_slice %114 {offsets = [24, 0], sizes = [8, 8], strides = [1, 1]} : vector<32x8xf32> to vector<8x8xf32>
    %cst_73 = arith.constant dense<0.000000e+00> : vector<8x8xf32>
    %180 = tpu.matmul %178, %179, %cst_73 {dimension_numbers = #tpu.dot_dimension_numbers<[1], [0], [0], [1], [0, 0, 1, 1], [], []>} : vector<8x8xf32>, vector<8x8xf32>, vector<8x8xf32> -> vector<8x8xf32>
    %cst_74 = arith.constant 0.353553385 : f32
    %181 = vector.broadcast %cst_74 : f32 to vector<8x8xf32>
    %182 = arith.mulf %180, %181 : vector<8x8xf32>
    %183 = vector.broadcast %117 : vector<1x8xf32> to vector<8x8xf32>
    %184 = arith.addf %182, %183 : vector<8x8xf32>
    %cst_75 = arith.constant dense<0xFF800000> : vector<8xf32>
    %185 = vector.multi_reduction <maximumf>, %184, %cst_75 [1] : vector<8x8xf32> to vector<8xf32>
    %186 = vector.shape_cast %185 : vector<8xf32> to vector<8x1xf32>
    %187 = vector.broadcast %186 : vector<8x1xf32> to vector<8x8xf32>
    %188 = arith.subf %184, %187 : vector<8x8xf32>
    %189 = math.exp %188 : vector<8x8xf32>
    %cst_76 = arith.constant dense<0.000000e+00> : vector<8xf32>
    %190 = vector.multi_reduction <add>, %189, %cst_76 [1] : vector<8x8xf32> to vector<8xf32>
    %191 = vector.shape_cast %190 : vector<8xf32> to vector<8x1xf32>
    %192 = tpu.reciprocal %191 {approx = true} : vector<8x1xf32> -> vector<8x1xf32>
    %193 = vector.broadcast %192 : vector<8x1xf32> to vector<8x8xf32>
    %194 = arith.mulf %189, %193 : vector<8x8xf32>
    %195 = vector.extract_strided_slice %115 {offsets = [0, 24], sizes = [8, 8], strides = [1, 1]} : vector<8x32xf32> to vector<8x8xf32>
    %cst_77 = arith.constant dense<0.000000e+00> : vector<8x8xf32>
    %196 = tpu.matmul %194, %195, %cst_77 {dimension_numbers = #tpu.dot_dimension_numbers<[1], [0], [0], [1], [0, 0, 1, 1], [], []>} : vector<8x8xf32>, vector<8x8xf32>, vector<8x8xf32> -> vector<8x8xf32>
    %c8_78 = arith.constant 8 : index
    %c24_79 = arith.constant 24 : index
    %197 = vector.load %arg27[%c8_78, %c24_79] : memref<16x32xf32, #tpu.memory_space<vmem>>, vector<8x8xf32>
    tpu.vector_store %arg27[%c8_78, %c24_79], %196 {strides = array<i32>} : memref<16x32xf32, #tpu.memory_space<vmem>>, vector<8x8xf32>,
    %c0_80 = arith.constant 0 : index
    %c0_81 = arith.constant 0 : index
    %198 = vector.load %arg27[%c0_80, %c0_81] : memref<16x32xf32, #tpu.memory_space<vmem>>, vector<16x32xf32>
    %199 = arith.truncf %198 : vector<16x32xf32> to vector<16x32xbf16>
    %c0_82 = arith.constant 0 : index
    %c0_83 = arith.constant 0 : index
    %c0_84 = arith.constant 0 : index
    %200 = vector.load %arg12[%c0_82, %c0_83, %c0_84] : memref<1x32x32xbf16, #tpu.memory_space<vmem>>, vector<1x32x32xbf16>
    %201 = vector.shape_cast %200 : vector<1x32x32xbf16> to vector<32x32xbf16>
    %cst_85 = arith.constant dense<0.000000e+00> : vector<16x32xf32>
    %202 = tpu.matmul %199, %201, %cst_85 {dimension_numbers = #tpu.dot_dimension_numbers<[1], [0], [0], [1], [0, 0, 1, 1], [], []>} : vector<16x32xbf16>, vector<32x32xbf16>, vector<16x32xf32> -> vector<16x32xf32>
    %c0_86 = arith.constant 0 : index
    %c0_87 = arith.constant 0 : index
    %c0_88 = arith.constant 0 : index
    %203 = vector.load %arg13[%c0_86, %c0_87, %c0_88] : memref<1x1x32xf32, #tpu.memory_space<vmem>>, vector<1x1x32xf32>
    %204 = vector.shape_cast %203 : vector<1x1x32xf32> to vector<1x32xf32>
    %205 = vector.broadcast %204 : vector<1x32xf32> to vector<16x32xf32>
    %206 = arith.addf %202, %205 : vector<16x32xf32>
    %207 = arith.addf %3, %206 : vector<16x32xf32>
    %c0_89 = arith.constant 0 : index
    %c0_90 = arith.constant 0 : index
    %c0_91 = arith.constant 0 : index
    %208 = vector.load %arg14[%c0_89, %c0_90, %c0_91] : memref<1x1x32xf32, #tpu.memory_space<vmem>>, vector<1x1x32xf32>
    %209 = vector.shape_cast %208 : vector<1x1x32xf32> to vector<1x32xf32>
    %c0_92 = arith.constant 0 : index
    %c0_93 = arith.constant 0 : index
    %c0_94 = arith.constant 0 : index
    %210 = vector.load %arg15[%c0_92, %c0_93, %c0_94] : memref<1x1x32xf32, #tpu.memory_space<vmem>>, vector<1x1x32xf32>
    %211 = vector.shape_cast %210 : vector<1x1x32xf32> to vector<1x32xf32>
    %cst_95 = arith.constant dense<0.000000e+00> : vector<16xf32>
    %212 = vector.multi_reduction <add>, %207, %cst_95 [1] : vector<16x32xf32> to vector<16xf32>
    %213 = vector.shape_cast %212 : vector<16xf32> to vector<16x1xf32>
    %cst_96 = arith.constant 3.200000e+01 : f32
    %214 = vector.broadcast %cst_96 : f32 to vector<16x1xf32>
    %215 = arith.divf %213, %214 : vector<16x1xf32>
    %216 = vector.broadcast %215 : vector<16x1xf32> to vector<16x32xf32>
    %217 = arith.subf %207, %216 : vector<16x32xf32>
    %218 = arith.mulf %217, %217 : vector<16x32xf32>
    %cst_97 = arith.constant dense<0.000000e+00> : vector<16xf32>
    %219 = vector.multi_reduction <add>, %218, %cst_97 [1] : vector<16x32xf32> to vector<16xf32>
    %220 = vector.shape_cast %219 : vector<16xf32> to vector<16x1xf32>
    %cst_98 = arith.constant 3.200000e+01 : f32
    %221 = vector.broadcast %cst_98 : f32 to vector<16x1xf32>
    %222 = arith.divf %220, %221 : vector<16x1xf32>
    %223 = vector.broadcast %215 : vector<16x1xf32> to vector<16x32xf32>
    %224 = arith.subf %207, %223 : vector<16x32xf32>
    %cst_99 = arith.constant 9.99999996E-13 : f32
    %225 = vector.broadcast %cst_99 : f32 to vector<16x1xf32>
    %226 = arith.addf %222, %225 : vector<16x1xf32>
    %227 = math.rsqrt %226 : vector<16x1xf32>
    %228 = vector.broadcast %227 : vector<16x1xf32> to vector<16x32xf32>
    %229 = arith.mulf %224, %228 : vector<16x32xf32>
    %230 = vector.broadcast %209 : vector<1x32xf32> to vector<16x32xf32>
    %231 = arith.mulf %229, %230 : vector<16x32xf32>
    %232 = vector.broadcast %211 : vector<1x32xf32> to vector<16x32xf32>
    %233 = arith.addf %231, %232 : vector<16x32xf32>
    %234 = arith.truncf %233 : vector<16x32xf32> to vector<16x32xbf16>
    %c0_100 = arith.constant 0 : index
    %c0_101 = arith.constant 0 : index
    %c0_102 = arith.constant 0 : index
    %235 = vector.load %arg16[%c0_100, %c0_101, %c0_102] : memref<1x32x64xbf16, #tpu.memory_space<vmem>>, vector<1x32x64xbf16>
    %236 = vector.shape_cast %235 : vector<1x32x64xbf16> to vector<32x64xbf16>
    %cst_103 = arith.constant dense<0.000000e+00> : vector<16x64xf32>
    %237 = tpu.matmul %234, %236, %cst_103 {dimension_numbers = #tpu.dot_dimension_numbers<[1], [0], [0], [1], [0, 0, 1, 1], [], []>} : vector<16x32xbf16>, vector<32x64xbf16>, vector<16x64xf32> -> vector<16x64xf32>
    %c0_104 = arith.constant 0 : index
    %c0_105 = arith.constant 0 : index
    %c0_106 = arith.constant 0 : index
    %238 = vector.load %arg17[%c0_104, %c0_105, %c0_106] : memref<1x1x64xf32, #tpu.memory_space<vmem>>, vector<1x1x64xf32>
    %239 = vector.shape_cast %238 : vector<1x1x64xf32> to vector<1x64xf32>
    %240 = vector.broadcast %239 : vector<1x64xf32> to vector<16x64xf32>
    %241 = arith.addf %237, %240 : vector<16x64xf32>
    %cst_107 = arith.constant 5.000000e-01 : f32
    %242 = vector.broadcast %cst_107 : f32 to vector<16x64xf32>
    %243 = arith.mulf %242, %241 : vector<16x64xf32>
    %cst_108 = arith.constant 0.707106769 : f32
    %244 = vector.broadcast %cst_108 : f32 to vector<16x64xf32>
    %245 = arith.mulf %241, %244 : vector<16x64xf32>
    %246 = math.absf %245 : vector<16x64xf32>
    %cst_109 = arith.constant 0.327591091 : f32
    %247 = vector.broadcast %cst_109 : f32 to vector<16x64xf32>
    %248 = arith.mulf %247, %246 : vector<16x64xf32>
    %cst_110 = arith.constant 1.000000e+00 : f32
    %249 = vector.broadcast %cst_110 : f32 to vector<16x64xf32>
    %250 = arith.addf %249, %248 : vector<16x64xf32>
    %cst_111 = arith.constant 1.000000e+00 : f32
    %251 = vector.broadcast %cst_111 : f32 to vector<16x64xf32>
    %252 = arith.divf %251, %250 : vector<16x64xf32>
    %cst_112 = arith.constant 1.06140542 : f32
    %253 = vector.broadcast %cst_112 : f32 to vector<16x64xf32>
    %254 = arith.mulf %253, %252 : vector<16x64xf32>
    %cst_113 = arith.constant -1.45315206 : f32
    %255 = vector.broadcast %cst_113 : f32 to vector<16x64xf32>
    %256 = arith.addf %254, %255 : vector<16x64xf32>
    %257 = arith.mulf %256, %252 : vector<16x64xf32>
    %cst_114 = arith.constant 1.42141378 : f32
    %258 = vector.broadcast %cst_114 : f32 to vector<16x64xf32>
    %259 = arith.addf %257, %258 : vector<16x64xf32>
    %260 = arith.mulf %259, %252 : vector<16x64xf32>
    %cst_115 = arith.constant -0.284496725 : f32
    %261 = vector.broadcast %cst_115 : f32 to vector<16x64xf32>
    %262 = arith.addf %260, %261 : vector<16x64xf32>
    %263 = arith.mulf %262, %252 : vector<16x64xf32>
    %cst_116 = arith.constant 0.254829586 : f32
    %264 = vector.broadcast %cst_116 : f32 to vector<16x64xf32>
    %265 = arith.addf %263, %264 : vector<16x64xf32>
    %266 = arith.mulf %265, %252 : vector<16x64xf32>
    %cst_117 = arith.constant 0.000000e+00 : f32
    %267 = vector.broadcast %cst_117 : f32 to vector<16x64xf32>
    %268 = arith.subf %267, %246 : vector<16x64xf32>
    %269 = arith.mulf %268, %246 : vector<16x64xf32>
    %270 = math.exp %269 : vector<16x64xf32>
    %271 = arith.mulf %266, %270 : vector<16x64xf32>
    %cst_118 = arith.constant 1.000000e+00 : f32
    %272 = vector.broadcast %cst_118 : f32 to vector<16x64xf32>
    %273 = arith.subf %272, %271 : vector<16x64xf32>
    %cst_119 = arith.constant 0.000000e+00 : f32
    %274 = vector.broadcast %cst_119 : f32 to vector<16x64xf32>
    %275 = arith.cmpf oge, %245, %274 : vector<16x64xf32>
    %cst_120 = arith.constant 0.000000e+00 : f32
    %276 = vector.broadcast %cst_120 : f32 to vector<16x64xf32>
    %277 = arith.subf %276, %273 : vector<16x64xf32>
    %278 = arith.select %275, %273, %277 : vector<16x64xi1>, vector<16x64xf32>
    %cst_121 = arith.constant 1.000000e+00 : f32
    %279 = vector.broadcast %cst_121 : f32 to vector<16x64xf32>
    %280 = arith.addf %279, %278 : vector<16x64xf32>
    %281 = arith.mulf %243, %280 : vector<16x64xf32>
    %282 = arith.truncf %281 : vector<16x64xf32> to vector<16x64xbf16>
    %c0_122 = arith.constant 0 : index
    %c0_123 = arith.constant 0 : index
    %c0_124 = arith.constant 0 : index
    %283 = vector.load %arg18[%c0_122, %c0_123, %c0_124] : memref<1x64x32xbf16, #tpu.memory_space<vmem>>, vector<1x64x32xbf16>
    %284 = vector.shape_cast %283 : vector<1x64x32xbf16> to vector<64x32xbf16>
    %cst_125 = arith.constant dense<0.000000e+00> : vector<16x32xf32>
    %285 = tpu.matmul %282, %284, %cst_125 {dimension_numbers = #tpu.dot_dimension_numbers<[1], [0], [0], [1], [0, 0, 1, 1], [], []>} : vector<16x64xbf16>, vector<64x32xbf16>, vector<16x32xf32> -> vector<16x32xf32>
    %c0_126 = arith.constant 0 : index
    %c0_127 = arith.constant 0 : index
    %c0_128 = arith.constant 0 : index
    %286 = vector.load %arg19[%c0_126, %c0_127, %c0_128] : memref<1x1x32xf32, #tpu.memory_space<vmem>>, vector<1x1x32xf32>
    %287 = vector.shape_cast %286 : vector<1x1x32xf32> to vector<1x32xf32>
    %288 = vector.broadcast %287 : vector<1x32xf32> to vector<16x32xf32>
    %289 = arith.addf %285, %288 : vector<16x32xf32>
    %290 = arith.addf %233, %289 : vector<16x32xf32>
    %c0_129 = arith.constant 0 : index
    %c0_130 = arith.constant 0 : index
    %c0_131 = arith.constant 0 : index
    %291 = vector.load %arg20[%c0_129, %c0_130, %c0_131] : memref<1x1x32xf32, #tpu.memory_space<vmem>>, vector<1x1x32xf32>
    %292 = vector.shape_cast %291 : vector<1x1x32xf32> to vector<1x32xf32>
    %c0_132 = arith.constant 0 : index
    %c0_133 = arith.constant 0 : index
    %c0_134 = arith.constant 0 : index
    %293 = vector.load %arg21[%c0_132, %c0_133, %c0_134] : memref<1x1x32xf32, #tpu.memory_space<vmem>>, vector<1x1x32xf32>
    %294 = vector.shape_cast %293 : vector<1x1x32xf32> to vector<1x32xf32>
    %cst_135 = arith.constant dense<0.000000e+00> : vector<16xf32>
    %295 = vector.multi_reduction <add>, %290, %cst_135 [1] : vector<16x32xf32> to vector<16xf32>
    %296 = vector.shape_cast %295 : vector<16xf32> to vector<16x1xf32>
    %cst_136 = arith.constant 3.200000e+01 : f32
    %297 = vector.broadcast %cst_136 : f32 to vector<16x1xf32>
    %298 = arith.divf %296, %297 : vector<16x1xf32>
    %299 = vector.broadcast %298 : vector<16x1xf32> to vector<16x32xf32>
    %300 = arith.subf %290, %299 : vector<16x32xf32>
    %301 = arith.mulf %300, %300 : vector<16x32xf32>
    %cst_137 = arith.constant dense<0.000000e+00> : vector<16xf32>
    %302 = vector.multi_reduction <add>, %301, %cst_137 [1] : vector<16x32xf32> to vector<16xf32>
    %303 = vector.shape_cast %302 : vector<16xf32> to vector<16x1xf32>
    %cst_138 = arith.constant 3.200000e+01 : f32
    %304 = vector.broadcast %cst_138 : f32 to vector<16x1xf32>
    %305 = arith.divf %303, %304 : vector<16x1xf32>
    %306 = vector.broadcast %298 : vector<16x1xf32> to vector<16x32xf32>
    %307 = arith.subf %290, %306 : vector<16x32xf32>
    %cst_139 = arith.constant 9.99999996E-13 : f32
    %308 = vector.broadcast %cst_139 : f32 to vector<16x1xf32>
    %309 = arith.addf %305, %308 : vector<16x1xf32>
    %310 = math.rsqrt %309 : vector<16x1xf32>
    %311 = vector.broadcast %310 : vector<16x1xf32> to vector<16x32xf32>
    %312 = arith.mulf %307, %311 : vector<16x32xf32>
    %313 = vector.broadcast %292 : vector<1x32xf32> to vector<16x32xf32>
    %314 = arith.mulf %312, %313 : vector<16x32xf32>
    %315 = vector.broadcast %294 : vector<1x32xf32> to vector<16x32xf32>
    %316 = arith.addf %314, %315 : vector<16x32xf32>
    %c0_140 = arith.constant 0 : index
    %c0_141 = arith.constant 0 : index
    %317 = vector.load %arg26[%c0_140, %c0_141] : memref<16x32xf32, #tpu.memory_space<vmem>>, vector<16x32xf32>
    tpu.vector_store %arg26[%c0_140, %c0_141], %316 {strides = array<i32>} : memref<16x32xf32, #tpu.memory_space<vmem>>, vector<16x32xf32>,
    %c1_i32 = arith.constant 1 : i32
    %318 = arith.cmpi eq, %arg0, %c1_i32 : i32
    %319 = arith.extui %318 : i1 to i32
    %c0_i32_142 = arith.constant 0 : i32
    %320 = arith.cmpi ne, %319, %c0_i32_142 : i32
    scf.if %320 {
      %321 = arith.truncf %316 : vector<16x32xf32> to vector<16x32xbf16>
      %c0_143 = arith.constant 0 : index
      %c0_144 = arith.constant 0 : index
      %322 = vector.load %arg22[%c0_143, %c0_144] : memref<32x128xbf16, #tpu.memory_space<vmem>>, vector<32x128xbf16>
      %cst_145 = arith.constant dense<0.000000e+00> : vector<16x128xf32>
      %323 = tpu.matmul %321, %322, %cst_145 {dimension_numbers = #tpu.dot_dimension_numbers<[1], [0], [0], [1], [0, 0, 1, 1], [], []>} : vector<16x32xbf16>, vector<32x128xbf16>, vector<16x128xf32> -> vector<16x128xf32>
      %c0_146 = arith.constant 0 : index
      %c0_147 = arith.constant 0 : index
      %324 = vector.load %arg23[%c0_146, %c0_147] : memref<1x128xf32, #tpu.memory_space<vmem>>, vector<1x128xf32>
      %325 = vector.broadcast %324 : vector<1x128xf32> to vector<16x128xf32>
      %326 = arith.addf %323, %325 : vector<16x128xf32>
      %c0_148 = arith.constant 0 : index
      %c0_149 = arith.constant 0 : index
      %327 = vector.load %arg24[%c0_148, %c0_149] : memref<16x128xf32, #tpu.memory_space<vmem>>, vector<16x128xf32>
      tpu.vector_store %arg24[%c0_148, %c0_149], %326 {strides = array<i32>} : memref<16x128xf32, #tpu.memory_space<vmem>>, vector<16x128xf32>,
      %c0_150 = arith.constant 0 : index
      %c0_151 = arith.constant 0 : index
      %328 = vector.load %arg3[%c0_150, %c0_151] : memref<16x1xi32, #tpu.memory_space<vmem>>, vector<16x1xi32>
      %cst_152 = arith.constant dense<0xFF800000> : vector<16xf32>
      %329 = vector.multi_reduction <maximumf>, %326, %cst_152 [1] : vector<16x128xf32> to vector<16xf32>
      %330 = vector.shape_cast %329 : vector<16xf32> to vector<16x1xf32>
      %331 = vector.broadcast %330 : vector<16x1xf32> to vector<16x128xf32>
      %332 = arith.subf %326, %331 : vector<16x128xf32>
      %333 = math.exp %332 : vector<16x128xf32>
      %cst_153 = arith.constant dense<0.000000e+00> : vector<16xf32>
      %334 = vector.multi_reduction <add>, %333, %cst_153 [1] : vector<16x128xf32> to vector<16xf32>
      %335 = vector.shape_cast %334 : vector<16xf32> to vector<16x1xf32>
      %336 = math.log %335 : vector<16x1xf32>
      %337 = arith.addf %330, %336 : vector<16x1xf32>
      %338 = tpu.iota {dimensions = array<i32: 1>} : vector<16x128xi32>
      %339 = vector.broadcast %328 : vector<16x1xi32> to vector<16x128xi32>
      %340 = arith.cmpi eq, %338, %339 : vector<16x128xi32>
      %cst_154 = arith.constant 0.000000e+00 : f32
      %341 = vector.broadcast %cst_154 : f32 to vector<16x128xf32>
      %342 = arith.select %340, %326, %341 : vector<16x128xi1>, vector<16x128xf32>
      %cst_155 = arith.constant dense<0.000000e+00> : vector<16xf32>
      %343 = vector.multi_reduction <add>, %342, %cst_155 [1] : vector<16x128xf32> to vector<16xf32>
      %344 = vector.shape_cast %343 : vector<16xf32> to vector<16x1xf32>
      %c-100_i32 = arith.constant -100 : i32
      %345 = vector.broadcast %c-100_i32 : i32 to vector<16x1xi32>
      %346 = arith.cmpi ne, %328, %345 : vector<16x1xi32>
      %347 = arith.extui %346 : vector<16x1xi1> to vector<16x1xi32>
      %348 = arith.sitofp %347 : vector<16x1xi32> to vector<16x1xf32>
      %349 = arith.subf %337, %344 : vector<16x1xf32>
      %350 = arith.mulf %349, %348 : vector<16x1xf32>
      %cst_156 = arith.constant dense<0.000000e+00> : vector<1xf32>
      %351 = vector.multi_reduction <add>, %350, %cst_156 [0] : vector<16x1xf32> to vector<1xf32>
      %352 = vector.shape_cast %351 : vector<1xf32> to vector<1x1xf32>
      %cst_157 = arith.constant dense<0.000000e+00> : vector<1xf32>
      %353 = vector.multi_reduction <add>, %348, %cst_157 [0] : vector<16x1xf32> to vector<1xf32>
      %354 = vector.shape_cast %353 : vector<1xf32> to vector<1x1xf32>
      %cst_158 = arith.constant 1.000000e+00 : f32
      %355 = vector.broadcast %cst_158 : f32 to vector<1x1xf32>
      %356 = arith.maximumf %354, %355 : vector<1x1xf32>
      %357 = arith.divf %352, %356 : vector<1x1xf32>
      %358 = vector.extract %357[0, 0] : f32 from vector<1x1xf32>
      %c0_159 = arith.constant 0 : index
      %c0_160 = arith.constant 0 : index
      %359 = memref.load %arg25[%c0_159, %c0_160] : memref<1x1xf32, #tpu.memory_space<smem>>
      memref.store %358, %arg25[%c0_159, %c0_160] : memref<1x1xf32, #tpu.memory_space<smem>>
    } else {
    }
    return
  }
  func.func @transform_0(%arg0: i32) -> (i32, i32) {
    %c0_i32 = arith.constant 0 : i32
    %c0_i32_0 = arith.constant 0 : i32
    %c0_i32_1 = arith.constant 0 : i32
    return %c0_i32, %c0_i32_0 : i32, i32
  }
  func.func @transform_1(%arg0: i32) -> (i32, i32, i32) {
    %c0_i32 = arith.constant 0 : i32
    %c0_i32_0 = arith.constant 0 : i32
    %c0_i32_1 = arith.constant 0 : i32
    %c0_i32_2 = arith.constant 0 : i32
    return %c0_i32, %c0_i32_0, %c0_i32_1 : i32, i32, i32
  }
  func.func @transform_2(%arg0: i32) -> (i32, i32) {
    %c0_i32 = arith.constant 0 : i32
    %c0_i32_0 = arith.constant 0 : i32
    %c0_i32_1 = arith.constant 0 : i32
    return %c0_i32, %c0_i32_0 : i32, i32
  }
  func.func @transform_3(%arg0: i32) -> (i32, i32) {
    %c0_i32 = arith.constant 0 : i32
    %c0_i32_0 = arith.constant 0 : i32
    %c0_i32_1 = arith.constant 0 : i32
    return %c0_i32, %c0_i32_0 : i32, i32
  }
  func.func @transform_4(%arg0: i32) -> (i32, i32) {
    %c0_i32 = arith.constant 0 : i32
    %c0_i32_0 = arith.constant 0 : i32
    %c0_i32_1 = arith.constant 0 : i32
    return %c0_i32, %c0_i32_0 : i32, i32
  }
  func.func @transform_5(%arg0: i32) -> (i32, i32, i32) {
    %c0_i32 = arith.constant 0 : i32
    %c0_i32_0 = arith.constant 0 : i32
    %c0_i32_1 = arith.constant 0 : i32
    return %arg0, %c0_i32, %c0_i32_0 : i32, i32, i32
  }
  func.func @transform_6(%arg0: i32) -> (i32, i32, i32) {
    %c0_i32 = arith.constant 0 : i32
    %c0_i32_0 = arith.constant 0 : i32
    %c0_i32_1 = arith.constant 0 : i32
    return %arg0, %c0_i32, %c0_i32_0 : i32, i32, i32
  }
  func.func @transform_7(%arg0: i32) -> (i32, i32, i32) {
    %c0_i32 = arith.constant 0 : i32
    %c0_i32_0 = arith.constant 0 : i32
    %c0_i32_1 = arith.constant 0 : i32
    return %arg0, %c0_i32, %c0_i32_0 : i32, i32, i32
  }
  func.func @transform_8(%arg0: i32) -> (i32, i32, i32) {
    %c0_i32 = arith.constant 0 : i32
    %c0_i32_0 = arith.constant 0 : i32
    %c0_i32_1 = arith.constant 0 : i32
    return %arg0, %c0_i32, %c0_i32_0 : i32, i32, i32
  }
  func.func @transform_9(%arg0: i32) -> (i32, i32, i32) {
    %c0_i32 = arith.constant 0 : i32
    %c0_i32_0 = arith.constant 0 : i32
    %c0_i32_1 = arith.constant 0 : i32
    return %arg0, %c0_i32, %c0_i32_0 : i32, i32, i32
  }
  func.func @transform_10(%arg0: i32) -> (i32, i32, i32) {
    %c0_i32 = arith.constant 0 : i32
    %c0_i32_0 = arith.constant 0 : i32
    %c0_i32_1 = arith.constant 0 : i32
    return %arg0, %c0_i32, %c0_i32_0 : i32, i32, i32
  }
  func.func @transform_11(%arg0: i32) -> (i32, i32, i32) {
    %c0_i32 = arith.constant 0 : i32
    %c0_i32_0 = arith.constant 0 : i32
    %c0_i32_1 = arith.constant 0 : i32
    return %arg0, %c0_i32, %c0_i32_0 : i32, i32, i32
  }
  func.func @transform_12(%arg0: i32) -> (i32, i32, i32) {
    %c0_i32 = arith.constant 0 : i32
    %c0_i32_0 = arith.constant 0 : i32
    %c0_i32_1 = arith.constant 0 : i32
    return %arg0, %c0_i32, %c0_i32_0 : i32, i32, i32
  }
  func.func @transform_13(%arg0: i32) -> (i32, i32, i32) {
    %c0_i32 = arith.constant 0 : i32
    %c0_i32_0 = arith.constant 0 : i32
    %c0_i32_1 = arith.constant 0 : i32
    return %arg0, %c0_i32, %c0_i32_0 : i32, i32, i32
  }
  func.func @transform_14(%arg0: i32) -> (i32, i32, i32) {
    %c0_i32 = arith.constant 0 : i32
    %c0_i32_0 = arith.constant 0 : i32
    %c0_i32_1 = arith.constant 0 : i32
    return %arg0, %c0_i32, %c0_i32_0 : i32, i32, i32
  }
  func.func @transform_15(%arg0: i32) -> (i32, i32, i32) {
    %c0_i32 = arith.constant 0 : i32
    %c0_i32_0 = arith.constant 0 : i32
    %c0_i32_1 = arith.constant 0 : i32
    return %arg0, %c0_i32, %c0_i32_0 : i32, i32, i32
  }
  func.func @transform_16(%arg0: i32) -> (i32, i32, i32) {
    %c0_i32 = arith.constant 0 : i32
    %c0_i32_0 = arith.constant 0 : i32
    %c0_i32_1 = arith.constant 0 : i32
    return %arg0, %c0_i32, %c0_i32_0 : i32, i32, i32
  }
  func.func @transform_17(%arg0: i32) -> (i32, i32, i32) {
    %c0_i32 = arith.constant 0 : i32
    %c0_i32_0 = arith.constant 0 : i32
    %c0_i32_1 = arith.constant 0 : i32
    return %arg0, %c0_i32, %c0_i32_0 : i32, i32, i32
  }
  func.func @transform_18(%arg0: i32) -> (i32, i32, i32) {
    %c0_i32 = arith.constant 0 : i32
    %c0_i32_0 = arith.constant 0 : i32
    %c0_i32_1 = arith.constant 0 : i32
    return %arg0, %c0_i32, %c0_i32_0 : i32, i32, i32
  }
  func.func @transform_19(%arg0: i32) -> (i32, i32, i32) {
    %c0_i32 = arith.constant 0 : i32
    %c0_i32_0 = arith.constant 0 : i32
    %c0_i32_1 = arith.constant 0 : i32
    return %arg0, %c0_i32, %c0_i32_0 : i32, i32, i32
  }
  func.func @transform_20(%arg0: i32) -> (i32, i32, i32) {
    %c0_i32 = arith.constant 0 : i32
    %c0_i32_0 = arith.constant 0 : i32
    %c0_i32_1 = arith.constant 0 : i32
    return %arg0, %c0_i32, %c0_i32_0 : i32, i32, i32
  }
  func.func @transform_21(%arg0: i32) -> (i32, i32) {
    %c0_i32 = arith.constant 0 : i32
    %c0_i32_0 = arith.constant 0 : i32
    %c0_i32_1 = arith.constant 0 : i32
    return %c0_i32, %c0_i32_0 : i32, i32
  }
  func.func @transform_22(%arg0: i32) -> (i32, i32) {
    %c0_i32 = arith.constant 0 : i32
    %c0_i32_0 = arith.constant 0 : i32
    %c0_i32_1 = arith.constant 0 : i32
    return %c0_i32, %c0_i32_0 : i32, i32
  }
  func.func @transform_23(%arg0: i32) -> (i32, i32) {
    %c0_i32 = arith.constant 0 : i32
    %c0_i32_0 = arith.constant 0 : i32
    %c0_i32_1 = arith.constant 0 : i32
    return %c0_i32, %c0_i32_0 : i32, i32
  }
  func.func @transform_24(%arg0: i32) -> (i32, i32) {
    %c0_i32 = arith.constant 0 : i32
    %c0_i32_0 = arith.constant 0 : i32
    %c0_i32_1 = arith.constant 0 : i32
    return %c0_i32, %c0_i32_0 : i32, i32
  }
}

</mosaic_0001>

<bundles_post_ra>
// kernel: uhc_bert_forward.1
= control target key start
LH: loop header
LB: loop body
LE: loop exit
PB: predicated region body
PF: predicated region fallthrough
CT: control target
= control target key end

     0   :  { %s3243_s0 = inlined_call_operand.vmem [shape: f32[16,32], index: 0, kind: input, shape index: {}]   ;;  %s3244_s1 = inlined_call_operand.vmem [shape: f32[2,1,8], index: 1, kind: input, shape index: {}]   ;;  %s3245_s2 = inlined_call_operand.vmem [shape: s32[16,1], index: 2, kind: input, shape index: {}]   ;;  %s3246_s3 = inlined_call_operand.vmem [shape: f32[1,32], index: 3, kind: input, shape index: {}]   ;;  %s3247_s4 = inlined_call_operand.vmem [shape: f32[1,32], index: 4, kind: input, shape index: {}]   ;;  %s3248_s5 = inlined_call_operand.vmem [shape: bf16[2,32,32], index: 5, kind: input, shape index: {}]   ;;  %s3249_s6 = inlined_call_operand.vmem [shape: f32[2,1,32], index: 6, kind: input, shape index: {}]   ;;  %s3250_s7 = inlined_call_operand.vmem [shape: bf16[2,32,32], index: 7, kind: input, shape index: {}]   ;;  %s3251_s8 = inlined_call_operand.vmem [shape: f32[2,1,32], index: 8, kind: input, shape index: {}]   ;;  %s3252_s9 = inlined_call_operand.vmem [shape: bf16[2,32,32], index: 9, kind: input, shape index: {}]   ;;  %s3253_s10 = inlined_call_operand.vmem [shape: f32[2,1,32], index: 10, kind: input, shape index: {}]   ;;  %s3254_s11 = inlined_call_operand.vmem [shape: bf16[2,32,32], index: 11, kind: input, shape index: {}]   ;;  %s3255_s12 = inlined_call_operand.vmem [shape: f32[2,1,32], index: 12, kind: input, shape index: {}]   ;;  %s3256_s13 = inlined_call_operand.vmem [shape: f32[2,1,32], index: 13, kind: input, shape index: {}]   ;;  %s3257_s14 = inlined_call_operand.vmem [shape: f32[2,1,32], index: 14, kind: input, shape index: {}]   ;;  %s3258_s15 = inlined_call_operand.vmem [shape: bf16[2,32,64], index: 15, kind: input, shape index: {}]   ;;  %s3259_s16 = inlined_call_operand.vmem [shape: f32[2,1,64], index: 16, kind: input, shape index: {}]   ;;  %s3260_s17 = inlined_call_operand.vmem [shape: bf16[2,64,32], index: 17, kind: input, shape index: {}]   ;;  %s3261_s18 = inlined_call_operand.vmem [shape: f32[2,1,32], index: 18, kind: input, shape index: {}]   ;;  %s3262_s19 = inlined_call_operand.vmem [shape: f32[2,1,32], index: 19, kind: input, shape index: {}]   ;;  %s3263_s20 = inlined_call_operand.vmem [shape: f32[2,1,32], index: 20, kind: input, shape index: {}]   ;;  %s3264_s21 = inlined_call_operand.vmem [shape: bf16[32,128], index: 21, kind: input, shape index: {}]   ;;  %s3265_s22 = inlined_call_operand.vmem [shape: f32[1,128], index: 22, kind: input, shape index: {}]   ;;  %s3266_s23 = inlined_call_operand.hbm [shape: f32[16,128], index: 23, kind: output, shape index: {0}]   ;;  %s3267_s24 = inlined_call_operand.hbm [shape: f32[1,1], index: 24, kind: output, shape index: {1}]  }
   0x1   :  { %3275 = sst [smem:[#allocation12_spill]] %s3243_s0 }
   0x2   :  { %3276 = sst [smem:[#allocation13_spill]] %s3244_s1 }
   0x3   :  { %3277 = sst [smem:[#allocation14_spill]] %s3245_s2 }
   0x4   :  { %3278 = sst [smem:[#allocation15_spill]] %s3246_s3 }
   0x5   :  { %3279 = sst [smem:[#allocation16_spill]] %s3247_s4 }
   0x6   :  { %3280 = sst [smem:[#allocation17_spill]] %s3248_s5 }
   0x7   :  { %3281 = sst [smem:[#allocation18_spill]] %s3249_s6 }
   0x8   :  { %3282 = sst [smem:[#allocation19_spill]] %s3250_s7 }
   0x9   :  { %3283 = sst [smem:[#allocation20_spill]] %s3251_s8 }
   0xa   :  { %3284 = sst [smem:[#allocation21_spill]] %s3252_s9 }
   0xb   :  { %3285 = sst [smem:[#allocation22_spill]] %s3254_s11 }
   0xc   :  { %3286 = sst [smem:[#allocation23_spill]] %s3258_s15 }
   0xd   :  { %3287 = sst [smem:[#allocation24_spill]] %s3263_s20 }
   0xe   :  { %3288 = sst [smem:[#allocation25_spill]] %s3264_s21 }
   0xf   :  { %3289 = sst [smem:[#allocation26_spill]] %s3265_s22 }
  0x10   :  { %3290 = sst [smem:[#allocation27_spill]] %s3266_s23 }
  0x11   :  { %3291 = sst [smem:[#allocation28_spill]] %s3267_s24 }
  0x12   :  { %30 = vsyncpa [#allocation5], 0 }
  0x13   :  { %31 = vsyncpa [#allocation6], 0  ;;  %s2869_s5 = smov 0  }
  0x14 LB: > { %3292 = sst [smem:[#allocation10_spill]] %s2729_s5  ;;  %s2875_s26 = sadd.s32 4294967295, %s2729_s5   ;;  %s2729_s5 = sphi %s2869_s5, %s37_s5  }
  0x15   : > { %3293 = sst [smem:[#allocation11_spill]] %s2875_s26  ;;  %p2414_p0 = scmp.ge.s32.totalorder %s2729_s5, 1 }
  0x16   : > { %p787_p1 = scmp.lt.s32.totalorder %s2729_s5, 3 }
  0x18   : > { %p788_p2 = pnand %p2414_p0, %p787_p1 }
  0x19   : > { %p903_p3 = scmp.lt.s32.totalorder (!%p788_p2), %s2875_s26, 1  ;;  %s3295_s3 = sld [smem:[#allocation17_spill]] (!%p788_p2) }
  0x1a   : > { %791 = sbr.rel (%p788_p2) target bundleno = 3076 (0xc04), region = 112  ;;  %s3296_s1 = sld [smem:[#allocation19_spill]] (!%p788_p2) }
  0x1b   : > { %s3298_s9 = sld [smem:[#allocation21_spill]] (!%p788_p2) }
  0x1c   : > { %s3299_s11 = sld [smem:[#allocation22_spill]] (!%p788_p2) }
  0x1d   : > { %s3300_s15 = sld [smem:[#allocation23_spill]] (!%p788_p2) }
  0x1e   : > { %s3301_s24 = sld [smem:[#allocation24_spill]] (!%p788_p2) }
  0x1f   : > { %s2881_s27 = scalar_select %p903_p3, %s2875_s26, 1 }
  0x20   : > { %s3302_s30 = sld [smem:[#allocation11_spill]] }
  0x21   : > { %s2533_s28 = sshll.u32 %s2881_s27, 4  ;;  %s956_s20 = scalar_lea.vmem %s3261_s18, %s2881_s27 }
  0x22   : > { %s2891_s25 = scalar_lea.vmem %s3295_s3, %s2533_s28  ;;  %s2896_s5 = scalar_lea.vmem %s3296_s1, %s2533_s28 }
  0x23   : > { %s2905_s6 = scalar_lea.vmem %s3298_s9, %s2533_s28  ;;  %s2914_s0 = scalar_lea.vmem %s3299_s11, %s2533_s28 }
  0x24   : > { %s2931_s29 = scalar_lea.vmem %s3300_s15, %s2533_s28  ;;  %s2538_s11 = sshll.u32 %s2881_s27, 5 }
  0x25   : > { %s2941_s1 = scalar_lea.vmem %s3260_s17, %s2538_s11  ;;  %s959_s9 = scalar_lea.vmem %s3262_s19, %s2881_s27 }
  0x26   : > { %s962_s15 = scalar_lea.vmem %s3301_s24, %s2881_s27  ;;  %p2427_p4 = scmp.ne.s32.totalorder %s3302_s30, 0 }
  0x27   : > { %s3303_s8 = sld [smem:[#allocation12_spill]] (!%p2427_p4) }
  0x28   : > { %967 = sbr.rel (%p2427_p4) target bundleno = 323 (0x143), region = 116  ;;  %s3304_s24 = sld [smem:[#allocation15_spill]] (!%p2427_p4) }
  0x29   : > { %s3305_s26 = sld [smem:[#allocation16_spill]] (!%p2427_p4) }
  0x2d   : > { %v968_v0 = vld [vmem:[%s3303_s8] sm:$0xff]  ;;  %vm972_vm0 = vcmask 261120   ;;  %v969_v2 = vld [vmem:[%s3303_s8 + $0x8] sm:$0xff]  ;;  %v2731_v4 = vmov 32.0  }
  0x2e   : > { %v973_v1 = vsel %vm972_vm0, %v968_v0, 0.0  ;;  %v976_v3 = vsel %vm972_vm0, %v969_v2, 0.0  ;;  %2592 = vrcp.f32 %v2731_v4  ;;  %v2590_v35 = vld [vmem:[%s3304_s24] ss:$0 sm:$0xff] }
  0x2f   : > { %974 = vadd.xlane.f32.xlu0 %v973_v1  ;;  %v2591_v38 = vld [vmem:[%s3305_s26] ss:$0 sm:$0xff] }
  0x34   : > { %v2593_v5 = vpop.eup %2592 }
  0x35   : > { %v980_v6 = vmul.f32 32.0, %v2593_v5  ;;  %vm984_vm1 = vweird.f32 %v2593_v5 }
  0x37   : > { %977 = vadd.xlane.f32.xlu0 %v976_v3  ;;  %v981_v7 = vsub.f32 1.0, %v980_v6 }
  0x39   : > { %v982_v8 = vmul.f32 %v2593_v5, %v981_v7 }
  0x3b   : > { %v983_v9 = vadd.f32 %v2593_v5, %v982_v8 }
  0x3d   : > { %v985_v10 = vsel %vm984_vm1, %v2593_v5, %v983_v9 }
  0xa2   : > { %v975_v11 = vpop.xlane.xlu0 %974 }
  0xa3   : > { %v986_v12 = vmul.f32 %v985_v10, %v975_v11 }
  0xa5   : > { %v988_v13 = vsub.f32 %v968_v0, %v986_v12 }
  0xa7   : > { %v990_v14 = vmul.f32 %v988_v13, %v988_v13 }
  0xa9   : > { %v992_v15 = vsel %vm972_vm0, %v990_v14, 0.0 }
  0xaa   : > { %993 = vadd.xlane.f32.xlu1 %v992_v15  ;;  %v978_v16 = vpop.xlane.xlu0 %977 }
  0xab   : > { %v987_v17 = vmul.f32 %v985_v10, %v978_v16 }
  0xad   : > { %v989_v18 = vsub.f32 %v969_v2, %v987_v17 }
  0xaf   : > { %v991_v19 = vmul.f32 %v989_v18, %v989_v18 }
  0xb1   : > { %v995_v20 = vsel %vm972_vm0, %v991_v19, 0.0 }
  0xb2   : > { %996 = vadd.xlane.f32.xlu1 %v995_v20 }
 0x11d   : > { %v994_v21 = vpop.xlane.xlu1 %993 }
 0x11e   : > { %v998_v22 = vmul.f32 %v994_v21, %v985_v10 }
 0x120   : > { %v1000_v23 = vadd.f32 1e-12, %v998_v22 }
 0x122   : > { %2594 = vrsqrt.f32 %v1000_v23  ;;  %vm1008_vm3 = vweird.f32 %v1000_v23 }
 0x125   : > { %v997_v24 = vpop.xlane.xlu1 %996 }
 0x126   : > { %v999_v25 = vmul.f32 %v997_v24, %v985_v10 }
 0x128   : > { %v2595_v26 = vpop.eup %2594  ;;  %v1001_v27 = vadd.f32 1e-12, %v999_v25 }
 0x129   : > { %v1003_v28 = vmul.f32 %v2595_v26, %v1000_v23  ;;  %vm1009_vm2 = vweird.f32 %v2595_v26 }
 0x12a   : > { %2596 = vrsqrt.f32 %v1001_v27  ;;  %vm1010_vm4 = vmor %vm1008_vm3, %vm1009_vm2  ;;  %vm1018_vm6 = vweird.f32 %v1001_v27 }
 0x12b   : > { %v1004_v29 = vmul.f32 %v2595_v26, %v1003_v28 }
 0x12d   : > { %v1005_v30 = vmul.f32 0.5, %v1004_v29 }
 0x12f   : > { %v1006_v31 = vsub.f32 1.5, %v1005_v30 }
 0x130   : > { %v2597_v32 = vpop.eup %2596 }
 0x131   : > { %v1007_v33 = vmul.f32 %v2595_v26, %v1006_v31  ;;  %v1013_v34 = vmul.f32 %v2597_v32, %v1001_v27  ;;  %vm1019_vm5 = vweird.f32 %v2597_v32 }
 0x132   : > { %vm1020_vm7 = vmor %vm1018_vm6, %vm1019_vm5 }
 0x133   : > { %v1011_v36 = vsel %vm1010_vm4, %v2595_v26, %v1007_v33  ;;  %v1014_v37 = vmul.f32 %v2597_v32, %v1013_v34 }
 0x134   : > { %v1022_v39 = vmul.f32 %v1011_v36, %v988_v13 }
 0x135   : > { %v1015_v40 = vmul.f32 0.5, %v1014_v37 }
 0x136   : > { %v1027_v41 = vmul.f32 %v2590_v35, %v1022_v39 }
 0x137   : > { %v1016_v42 = vsub.f32 1.5, %v1015_v40 }
 0x138   : > { %v1032_v43 = vadd.f32 %v2591_v38, %v1027_v41 }
 0x139   : > { %v1017_v44 = vmul.f32 %v2597_v32, %v1016_v42 }
 0x13a   : > { %1034 = vst.msk [vmem:[#allocation2] sm:$0xff] %vm972_vm0, %v1032_v43 }
 0x13b   : > { %v1021_v45 = vsel %vm1020_vm7, %v2597_v32, %v1017_v44 }
 0x13c   : > { %v1023_v46 = vmul.f32 %v1021_v45, %v989_v18 }
 0x13e   : > { %v1028_v47 = vmul.f32 %v2590_v35, %v1023_v46 }
 0x140   : > { %v1033_v48 = vadd.f32 %v2591_v38, %v1028_v47 }
 0x142   : > { %1035 = vst.msk [vmem:[#allocation2 + $0x8] sm:$0xff] %vm972_vm0, %v1033_v48 }
 0x143 PF: > { %v2542_v49 = vld [vmem:[%s2896_s5 + $0x8] sm:$0xff]  ;;  %v2541_v51 = vld [vmem:[%s2896_s5] sm:$0xff]  ;;  %vm1059_vm8 = vcmask 261120   ;;  %s3306_s28 = sld [smem:[#allocation20_spill]]  ;;  %vm1146_vm9 = vcmask 64512   ;;  %s2732_s4 = smov 112  }
 0x144   : > { %v2540_v50 = vld [vmem:[%s2891_s25 + $0x8] sm:$0xff]  ;;  %v2539_v52 = vld [vmem:[%s2891_s25] sm:$0xff]  ;;  %1103 = vmatpush.bf16.msra.mxu1 %v2542_v49  ;;  %s3308_s3 = sld [smem:[#allocation18_spill]]  ;;  %s2733_s21 = smov 120   ;;  %vm1285_vm10 = vcmask 130112   ;;  %vm1358_vm11 = vcmask 195712  }
 0x145   : > { %v2978_v53 = vld [vmem:[#allocation2] sm:$0xff]  ;;  %1069 = vmatpush.bf16.msra.mxu0 %v2540_v50  ;;  %v2544_v55 = vld [vmem:[%s2905_s6 + $0x8] sm:$0xff]  ;;  %s2734_s7 = smov 104   ;;  %s3310_s22 = scalar_lea.vmem %s3253_s10, %s2881_s27  ;;  %vm1431_vm12 = vcmask 261312  }
 0x146   : > { %v2543_v56 = vld [vmem:[%s2905_s6] sm:$0xff]  ;;  %1137 = vmatpush.bf16.msra.mxu2 %v2544_v55  ;;  %s3311_s25 = sld [smem:[#allocation13_spill]]  ;;  %s2735_s30 = smov 8  }
 0x147   : > { %v3016_v4 = vld [vmem:[%s3310_s22] ss:$0 sm:$0xff]  ;;  %s2736_s6 = smov 16   ;;  %s3314_s22 = scalar_lea.vmem %s3257_s14, %s2881_s27 }
 0x148   : > { %1104 = vmatpush.bf16.msra.mxu1 %v2541_v51 }
 0x149   : > { %v2980_v54 = vld [vmem:[#allocation2 + $0x8] sm:$0xff]  ;;  %1070 = vmatpush.bf16.msra.mxu0 %v2539_v52  ;;  %s3307_s2 = scalar_lea.vmem %s3306_s28, %s2881_s27  ;;  %s3315_s28 = scalar_lea.vmem %s3259_s16, %s2881_s27 }
 0x14a   : > { %v1038_v57 = vpack.c.bf16 %v2980_v54, %v2978_v53  ;;  %1138 = vmatpush.bf16.msra.mxu2 %v2543_v56  ;;  %v2598_v58 = vld [vmem:[%s3307_s2] ss:$0 sm:$0xff]  ;;  %s3309_s11 = scalar_lea.vmem %s3308_s3, %s2881_s27  ;;  %s2737_s3 = smov 24  }
 0x14b   : > { %v2599_v59 = vld [vmem:[%s3309_s11] ss:$0 sm:$0xff] }
 0x14c   : > { %2445 = vmatmul.msk.bf16.vlgmr.msra.gmra.mxu1 %vm1059_vm8, %v1038_v57  ;;  %2436 = vmatmul.msk.bf16.vlgmr.msra.gmra.mxu0 %vm1059_vm8, %v1038_v57  ;;  %v3028_v9 = vld [vmem:[%s3311_s25] ss:$0 sm:$0xff]  ;;  %v2602_v34 = vld [vmem:[%s3311_s25 + $0x1] ss:$0 sm:$0xff] }
 0x14d   : > { %2454 = vmatmul.msk.bf16.vlgmr.msra.gmra.mxu2 %vm1059_vm8, %v1038_v57 }
 0x1c9   : > { %v1106_v60 = vpop.f32.mrf.mxu1  ;;  %v1072_v62 = vpop.f32.mrf.mxu0 }
 0x1ca   : > { %v1107_v61 = vadd.f32 %v2598_v58, %v1106_v60  ;;  %v1073_v63 = vadd.f32 %v2599_v59, %v1072_v62 }
 0x1cc   : > { %1289 = vrot.lane.b32.xlu2 %v1107_v61, %s2732_s4  ;;  %1215 = vrot.lane.b32.xlu1 %v1107_v61, %s2733_s21 }
 0x1cd   : > { %2455 = vmatpush.xpose.msk.msrb.mxu0 %vm1146_vm9, %v1107_v61 }
 0x1d0   : > { %2456 = vmatmul.msk.f32.vlgmr.msrb.gmra.mxu0 %vm1146_vm9, %v1073_v63  ;;  %v1140_v5 = vpop.f32.mrf.mxu2 }
 0x1d1   : > { %v1108_v0 = vpop.f32.mrf.mxu1  ;;  %v1074_v2 = vpop.f32.mrf.mxu0  ;;  %v3019_v6 = vadd.f32 %v3016_v4, %v1140_v5 }
 0x1d2   : > { %v1109_v1 = vadd.f32 %v2598_v58, %v1108_v0  ;;  %v1075_v3 = vadd.f32 %v2599_v59, %v1074_v2 }
 0x1d3   : > { %1207 = vmatpush.msra.mxu3 %v3019_v6 }
 0x1d4   : > { %1362 = vrot.lane.b32.xlu2 %v1107_v61, %s2734_s7  ;;  %1213 = vrot.lane.b32.xlu1 %v1073_v63, %s2733_s21 }
 0x1dc   : > { %1503 = vrot.lane.b32.xlu2 %v1109_v1, %s2733_s21  ;;  %1360 = vrot.lane.b32.xlu1 %v1073_v63, %s2734_s7 }
 0x1e4   : > { %1576 = vrot.lane.b32.xlu2 %v1109_v1, %s2732_s4  ;;  %1501 = vrot.lane.b32.xlu1 %v1075_v3, %s2733_s21 }
 0x1ec   : > { %1574 = vrot.lane.b32.xlu2 %v1075_v3, %s2732_s4  ;;  %1648 = vrot.lane.b32.xlu1 %v1109_v1, %s2734_s7 }
 0x226   : > { %v1290_v7 = vpop.permute.xlu2 %1289 }
 0x227   : > { %2461 = vmatpush.xpose.msk.msrb.mxu1 %vm1146_vm9, %v1290_v7 }
 0x22b   : > { %2468 = vmatpush.xpose.msk.msra.mxu1 %vm1146_vm9, %v1109_v1 }
 0x22e   : > { %v1363_v14 = vpop.permute.xlu2 %1362 }
 0x236   : > { %v1504_v18 = vpop.permute.xlu2 %1503 }
 0x23e   : > { %v1216_v8 = vpop.permute.xlu1 %1215  ;;  %v1577_v22 = vpop.permute.xlu2 %1576 }
 0x23f   : > { %2458 = vmatpush.xpose.msk.msrb.mxu3 %vm1146_vm9, %v1216_v8 }
 0x246   : > { %v1575_v23 = vpop.permute.xlu2 %1574  ;;  %v1214_v24 = vpop.permute.xlu1 %1213 }
 0x24d   : > { %v1170_v10 = vpop.f32.mrf.mxu0 }
 0x24e   : > { %v1173_v11 = vmul.f32 0.35355338, %v1170_v10  ;;  %v1361_v26 = vpop.permute.xlu1 %1360 }
 0x250   : > { %v1177_v12 = vadd.f32 %v3028_v9, %v1173_v11 }
 0x252   : > { %v1178_v13 = vsel %vm1146_vm9, %v1177_v12, -inf }
 0x253   : > { %1179 = vmax.xlane.f32.xlu0 %v1178_v13 }
 0x256   : > { %v1502_v29 = vpop.permute.xlu1 %1501 }
 0x25e   : > { %v1649_v36 = vpop.permute.xlu1 %1648 }
 0x267   : > { %1287 = vrot.lane.b32.xlu0 %v1073_v63, %s2732_s4 }
 0x2c6   : > { %v1180_v15 = vpop.xlane.xlu0 %1179 }
 0x2c7   : > { %v1181_v16 = vsub.f32 %v1177_v12, %v1180_v15 }
 0x2c9   : > { %v1182_v17 = vmul.f32 1.442695, %v1181_v16 }
 0x2cb   : > { %2610 = vpow2.f32 %v1182_v17 }
 0x2d1   : > { %v2611_v19 = vpop.eup %2610 }
 0x2d2   : > { %v1184_v20 = vsel %vm1146_vm9, %v2611_v19, 0.0 }
 0x2d3   : > { %1185 = vadd.xlane.f32.xlu0 %v1184_v20 }
 0x2d9   : > { %v1288_v21 = vpop.permute.xlu0 %1287 }
 0x2da   : > { %2462 = vmatmul.msk.f32.vlgmr.msrb.gmra.mxu1 %vm1146_vm9, %v1288_v21 }
 0x2db   : > { %2474 = vmatpush.xpose.msk.msrb.mxu1 %vm1146_vm9, %v1577_v22 }
 0x2e2   : > { %2469 = vmatmul.msk.f32.vlgmr.msra.gmra.mxu1 %vm1146_vm9, %v1075_v3 }
 0x2e7   : > { %1646 = vrot.lane.b32.xlu0 %v1075_v3, %s2734_s7 }
 0x2ea   : > { %2475 = vmatmul.msk.f32.vlgmr.msrb.gmra.mxu1 %vm1146_vm9, %v1575_v23 }
 0x346   : > { %v1186_v25 = vpop.xlane.xlu0 %1185 }
 0x347   : > { %2612 = vrcp.f32 %v1186_v25 }
 0x34d   : > { %v2613_v27 = vpop.eup %2612 }
 0x34e   : > { %v1188_v28 = vmul.f32 %v2613_v27, %v2611_v19 }
 0x350   : > { %2457 = vmatmul.msk.f32.vlgmr.msra.gmra.mxu3 %vm1146_vm9, %v1188_v28 }
 0x351   : > { %2464 = vmatpush.xpose.msk.msra.mxu3 %vm1146_vm9, %v1363_v14 }
 0x357   : > { %v1312_v30 = vpop.f32.mrf.mxu1 }
 0x358   : > { %v1315_v31 = vmul.f32 0.35355338, %v1312_v30  ;;  %2459 = vmatmul.msk.f32.vlgmr.msrb.gmra.mxu3 %vm1146_vm9, %v1214_v24 }
 0x359   : > { %2471 = vmatpush.xpose.msk.msrb.mxu3 %vm1146_vm9, %v1504_v18  ;;  %v1647_v44 = vpop.permute.xlu0 %1646 }
 0x35a   : > { %v1316_v32 = vadd.f32 %v3028_v9, %v1315_v31 }
 0x35c   : > { %v1317_v33 = vsel %vm1146_vm9, %v1316_v32, -inf }
 0x35d   : > { %1318 = vmax.xlane.f32.xlu2 %v1317_v33 }
 0x35f   : > { %v1458_v35 = vpop.f32.mrf.mxu1 }
 0x360   : > { %v1461_v37 = vmul.f32 0.35355338, %v1458_v35  ;;  %2465 = vmatmul.msk.f32.vlgmr.msra.gmra.mxu3 %vm1146_vm9, %v1361_v26 }
 0x361   : > { %2477 = vmatpush.xpose.msk.msra.mxu3 %vm1146_vm9, %v1649_v36 }
 0x362   : > { %v1465_v38 = vadd.f32 %v2602_v34, %v1461_v37 }
 0x364   : > { %v1466_v39 = vsel %vm1146_vm9, %v1465_v38, -inf }
 0x365   : > { %1467 = vmax.xlane.f32.xlu2 %v1466_v39 }
 0x367   : > { %v1599_v40 = vpop.f32.mrf.mxu1 }
 0x368   : > { %v1602_v41 = vmul.f32 0.35355338, %v1599_v40  ;;  %2472 = vmatmul.msk.f32.vlgmr.msrb.gmra.mxu3 %vm1146_vm9, %v1502_v29  ;;  %v1142_v29 = vpop.f32.mrf.mxu2 }
 0x369   : > { %v1143_v30 = vadd.f32 %v3016_v4, %v1142_v29 }
 0x36a   : > { %v3052_v42 = vadd.f32 %v2602_v34, %v1602_v41 }
 0x36c   : > { %v1604_v43 = vsel %vm1146_vm9, %v3052_v42, -inf }
 0x36d   : > { %1605 = vmax.xlane.f32.xlu0 %v1604_v43 }
 0x370   : > { %2478 = vmatmul.msk.f32.vlgmr.msra.gmra.mxu3 %vm1146_vm9, %v1647_v44 }
 0x3d0   : > { %v1319_v45 = vpop.xlane.xlu2 %1318 }
 0x3d1   : > { %v1320_v46 = vsub.f32 %v1316_v32, %v1319_v45 }
 0x3d3   : > { %v1321_v47 = vmul.f32 1.442695, %v1320_v46  ;;  %v1209_v48 = vpop.f32.mrf.mxu3 }
 0x3d4   : > { %1212 = vst.msk [vmem:[#allocation3] sm:$0xff] %vm1146_vm9, %v1209_v48 }
 0x3d5   : > { %2614 = vpow2.f32 %v1321_v47 }
 0x3d8   : > { %v1468_v51 = vpop.xlane.xlu2 %1467 }
 0x3d9   : > { %v1469_v57 = vsub.f32 %v1465_v38, %v1468_v51 }
 0x3db   : > { %v3058_v49 = vpop.eup %2614  ;;  %v1238_v50 = vpop.f32.mrf.mxu3  ;;  %v1470_v59 = vmul.f32 1.442695, %v1469_v57 }
 0x3dc   : > { %v1241_v52 = vmul.f32 0.35355338, %v1238_v50  ;;  %v1323_v55 = vsel %vm1146_vm9, %v3058_v49, 0.0 }
 0x3dd   : > { %1324 = vadd.xlane.f32.xlu0 %v1323_v55  ;;  %2616 = vpow2.f32 %v1470_v59 }
 0x3de   : > { %v1242_v56 = vadd.f32 %v3028_v9, %v1241_v52 }
 0x3e0   : > { %v1243_v58 = vsel %vm1146_vm9, %v1242_v56, -inf  ;;  %v1606_v12 = vpop.xlane.xlu0 %1605 }
 0x3e1   : > { %1244 = vmax.xlane.f32.xlu1 %v1243_v58  ;;  %v1607_v31 = vsub.f32 %v3052_v42, %v1606_v12 }
 0x3e3   : > { %v1385_v60 = vpop.f32.mrf.mxu3  ;;  %v3066_v2 = vpop.eup %2616  ;;  %v1608_v33 = vmul.f32 1.442695, %v1607_v31  ;;  %v2738_v31 = vmov 32.0  }
 0x3e4   : > { %v1388_v61 = vmul.f32 0.35355338, %v1385_v60  ;;  %v1472_v5 = vsel %vm1146_vm9, %v3066_v2, 0.0 }
 0x3e6   : > { %v1389_v62 = vadd.f32 %v3028_v9, %v1388_v61 }
 0x3e8   : > { %v1390_v63 = vsel %vm1146_vm9, %v1389_v62, -inf }
 0x3e9   : > { %1391 = vmax.xlane.f32.xlu0 %v1390_v63 }
 0x3eb   : > { %v1526_v0 = vpop.f32.mrf.mxu3 }
 0x3ec   : > { %v1529_v1 = vmul.f32 0.35355338, %v1526_v0 }
 0x3ee   : > { %v1530_v3 = vadd.f32 %v2602_v34, %v1529_v1 }
 0x3f0   : > { %v1531_v7 = vsel %vm1146_vm9, %v1530_v3, -inf }
 0x3f1   : > { %1473 = vadd.xlane.f32.xlu0 %v1472_v5  ;;  %1532 = vmax.xlane.f32.xlu1 %v1531_v7 }
 0x3f3   : > { %v1671_v8 = vpop.f32.mrf.mxu3 }
 0x3f4   : > { %v1674_v10 = vmul.f32 0.35355338, %v1671_v8 }
 0x3f6   : > { %v1675_v11 = vadd.f32 %v2602_v34, %v1674_v10 }
 0x3f8   : > { %v1676_v9 = vsel %vm1146_vm9, %v1675_v11, -inf }
 0x3f9   : > { %1677 = vmax.xlane.f32.xlu2 %v1676_v9 }
 0x405   : > { %1401 = vrot.lane.b32.xlu0 %v3019_v6, %s2734_s7 }
 0x450   : > { %v1325_v13 = vpop.xlane.xlu0 %1324 }
 0x454   : > { %v1245_v14 = vpop.xlane.xlu1 %1244 }
 0x455   : > { %v1246_v15 = vsub.f32 %v1242_v56, %v1245_v14 }
 0x457   : > { %v1247_v16 = vmul.f32 1.442695, %v1246_v15  ;;  %v2546_v15 = vld [vmem:[%s2914_s0 + $0x8] sm:$0xff] }
 0x458   : > { %1750 = vmatpush.bf16.msra.mxu1 %v2546_v15  ;;  %v2606_v15 = vld [vmem:[%s3315_s28] ss:$0 sm:$0xff] }
 0x459   : > { %2618 = vpow2.f32 %v1247_v16  ;;  %v2545_v16 = vld [vmem:[%s2914_s0] sm:$0xff] }
 0x45c   : > { %v1392_v17 = vpop.xlane.xlu0 %1391  ;;  %1751 = vmatpush.bf16.msra.mxu1 %v2545_v16 }
 0x45d   : > { %v1393_v18 = vsub.f32 %v1389_v62, %v1392_v17 }
 0x45f   : > { %v2619_v19 = vpop.eup %2618  ;;  %v1394_v20 = vmul.f32 1.442695, %v1393_v18 }
 0x460   : > { %v1249_v21 = vsel %vm1146_vm9, %v2619_v19, 0.0 }
 0x461   : > { %2620 = vpow2.f32 %v1394_v20  ;;  %1250 = vadd.xlane.f32.xlu1 %v1249_v21 }
 0x464   : > { %v1533_v22 = vpop.xlane.xlu1 %1532  ;;  %v1474_v39 = vpop.xlane.xlu0 %1473 }
 0x465   : > { %v1534_v23 = vsub.f32 %v1530_v3, %v1533_v22 }
 0x467   : > { %v2621_v24 = vpop.eup %2620  ;;  %v1535_v25 = vmul.f32 1.442695, %v1534_v23 }
 0x468   : > { %v1396_v26 = vsel %vm1146_vm9, %v2621_v24, 0.0 }
 0x469   : > { %2622 = vpow2.f32 %v1535_v25  ;;  %1397 = vadd.xlane.f32.xlu2 %v1396_v26 }
 0x46a   : > { %2624 = vpow2.f32 %v1608_v33 }
 0x46c   : > { %v1678_v32 = vpop.xlane.xlu2 %1677 }
 0x46d   : > { %v1679_v34 = vsub.f32 %v1675_v11, %v1678_v32 }
 0x46f   : > { %v2623_v27 = vpop.eup %2622  ;;  %v1680_v35 = vmul.f32 1.442695, %v1679_v34 }
 0x470   : > { %v1537_v28 = vsel %vm1146_vm9, %v2623_v27, 0.0  ;;  %v2625_v36 = vpop.eup %2624 }
 0x471   : > { %1538 = vadd.xlane.f32.xlu0 %v1537_v28  ;;  %2626 = vpow2.f32 %v1680_v35  ;;  %v1610_v37 = vsel %vm1146_vm9, %v2625_v36, 0.0 }
 0x472   : > { %2628 = vrcp.f32 %v1325_v13 }
 0x473   : > { %2630 = vrcp.f32 %v1474_v39 }
 0x477   : > { %v1402_v44 = vpop.permute.xlu0 %1401 }
 0x47a   : > { %1255 = vrot.lane.b32.xlu1 %v3019_v6, %s2733_s21 }
 0x481   : > { %1328 = vrot.lane.b32.xlu2 %v3019_v6, %s2732_s4  ;;  %v2627_v6 = vpop.eup %2626 }
 0x482   : > { %v1682_v4 = vsel %vm1146_vm9, %v2627_v6, 0.0  ;;  %v2629_v41 = vpop.eup %2628 }
 0x483   : > { %v1327_v43 = vmul.f32 %v2629_v41, %v3058_v49  ;;  %v2631_v45 = vpop.eup %2630 }
 0x484   : > { %v1476_v47 = vmul.f32 %v2631_v45, %v3066_v2 }
 0x485   : > { %1543 = vrot.lane.b32.xlu0 %v1143_v30, %s2733_s21  ;;  %s3312_s21 = scalar_lea.vmem %s3255_s12, %s2881_s27 }
 0x486   : > { %v2603_v22 = vld [vmem:[%s3312_s21] ss:$0 sm:$0xff] }
 0x48d   : > { %1615 = vrot.lane.b32.xlu0 %v1143_v30, %s2732_s4 }
 0x495   : > { %1687 = vrot.lane.b32.xlu0 %v1143_v30, %s2734_s7  ;;  %s3313_s7 = scalar_lea.vmem %s3256_s13, %s2881_s27 }
 0x4a4   : > { %1611 = vadd.xlane.f32.xlu1 %v1610_v37 }
 0x4aa   : > { %1683 = vadd.xlane.f32.xlu2 %v1682_v4 }
 0x4d4   : > { %v1251_v40 = vpop.xlane.xlu1 %1250 }
 0x4d5   : > { %2632 = vrcp.f32 %v1251_v40 }
 0x4db   : > { %v2633_v46 = vpop.eup %2632 }
 0x4dc   : > { %v1398_v38 = vpop.xlane.xlu2 %1397  ;;  %v1253_v48 = vmul.f32 %v2633_v46, %v2619_v19 }
 0x4dd   : > { %2634 = vrcp.f32 %v1398_v38 }
 0x4e3   : > { %v2635_v49 = vpop.eup %2634 }
 0x4e4   : > { %v1329_v42 = vpop.permute.xlu2 %1328  ;;  %v1539_v51 = vpop.xlane.xlu0 %1538  ;;  %v1400_v52 = vmul.f32 %v2635_v49, %v2621_v24 }
 0x4e5   : > { %1349 = vmatpush.msrb.mxu2 %v1329_v42  ;;  %2636 = vrcp.f32 %v1539_v51 }
 0x4e6   : > { %2463 = vmatmul.msk.f32.vlgmr.msrb.gmra.mxu2 %vm1146_vm9, %v1327_v43 }
 0x4e7   : > { %1495 = vmatpush.msra.mxu2 %v1143_v30 }
 0x4eb   : > { %v2637_v56 = vpop.eup %2636 }
 0x4ec   : > { %v1256_v50 = vpop.permute.xlu1 %1255  ;;  %v1541_v57 = vmul.f32 %v2637_v56, %v2623_v27 }
 0x4ed   : > { %1276 = vmatpush.msra.mxu0 %v1256_v50 }
 0x4ee   : > { %2460 = vmatmul.msk.f32.vlgmr.msra.gmra.mxu0 %vm1146_vm9, %v1253_v48  ;;  %2470 = vmatmul.msk.f32.vlgmr.msra.gmra.mxu2 %vm1146_vm9, %v1476_v47  ;;  %v2547_v48 = vld [vmem:[%s2931_s29] sm:$0xff] }
 0x4ef   : > { %1422 = vmatpush.msrb.mxu0 %v1402_v44  ;;  %v2548_v44 = vld [vmem:[%s2931_s29 + $0x8] sm:$0xff] }
 0x4f6   : > { %2466 = vmatmul.msk.f32.vlgmr.msrb.gmra.mxu0 %vm1146_vm9, %v1400_v52 }
 0x4f7   : > { %v1544_v55 = vpop.permute.xlu0 %1543 }
 0x4f8   : > { %1564 = vmatpush.msra.mxu0 %v1544_v55 }
 0x4fe   : > { %2473 = vmatmul.msk.f32.vlgmr.msra.gmra.mxu0 %vm1146_vm9, %v1541_v57 }
 0x4ff   : > { %v1616_v58 = vpop.permute.xlu0 %1615 }
 0x500   : > { %1636 = vmatpush.msrb.mxu2 %v1616_v58 }
 0x502   : > { %1853 = vmatpush.bf16.msra.mxu2 %v2548_v44 }
 0x506   : > { %1854 = vmatpush.bf16.msra.mxu2 %v2547_v48 }
 0x507   : > { %v1688_v59 = vpop.permute.xlu0 %1687 }
 0x508   : > { %1708 = vmatpush.msrb.mxu0 %v1688_v59 }
 0x517   : > { %v1612_v60 = vpop.xlane.xlu1 %1611 }
 0x518   : > { %2638 = vrcp.f32 %v1612_v60 }
 0x51d   : > { %v1684_v61 = vpop.xlane.xlu2 %1683 }
 0x51e   : > { %v2639_v62 = vpop.eup %2638  ;;  %2640 = vrcp.f32 %v1684_v61 }
 0x51f   : > { %v1614_v63 = vmul.f32 %v2639_v62, %v2625_v36  ;;  %2642 = vrcp.f32 %v2738_v31  ;;  %v2552_v31 = vld [vmem:[%s2941_s1 + $0x18] sm:$0xff] }
 0x520   : > { %1986 = vmatpush.bf16.msrb.mxu3 %v2552_v31 }
 0x521   : > { %2476 = vmatmul.msk.f32.vlgmr.msrb.gmra.mxu2 %vm1146_vm9, %v1614_v63 }
 0x524   : > { %v2641_v0 = vpop.eup %2640 }
 0x525   : > { %v1686_v1 = vmul.f32 %v2641_v0, %v2627_v6  ;;  %v2643_v32 = vpop.eup %2642 }
 0x526   : > { %v1769_v33 = vmul.f32 32.0, %v2643_v32  ;;  %vm1773_vm13 = vweird.f32 %v2643_v32 }
 0x527   : > { %2479 = vmatmul.msk.f32.vlgmr.msrb.gmra.mxu0 %vm1146_vm9, %v1686_v1 }
 0x528   : > { %v1770_v34 = vsub.f32 1.0, %v1769_v33 }
 0x52a   : > { %v1771_v35 = vmul.f32 %v2643_v32, %v1770_v34 }
 0x52c   : > { %v1772_v36 = vadd.f32 %v2643_v32, %v1771_v35 }
 0x569   : > { %v1351_v2 = vpop.f32.mrf.mxu2 }
 0x56b   : > { %v1278_v3 = vpop.f32.mrf.mxu0 }
 0x56c   : > { %1282 = vrot.lane.b32.xlu0 %v1278_v3, %s2735_s30 }
 0x571   : > { %v1497_v5 = vpop.f32.mrf.mxu2 }
 0x572   : > { %1500 = vst.msk [vmem:[#allocation3 + $0x8] sm:$0xff] %vm1146_vm9, %v1497_v5 }
 0x573   : > { %v1424_v7 = vpop.f32.mrf.mxu0 }
 0x574   : > { %1355 = vrot.lane.b32.xlu0 %v1351_v2, %s2736_s6  ;;  %v2604_v2 = vld [vmem:[%s3313_s7] ss:$0 sm:$0xff] }
 0x57b   : > { %v1566_v8 = vpop.f32.mrf.mxu0 }
 0x57c   : > { %1428 = vrot.lane.b32.xlu0 %v1424_v7, %s2737_s3  ;;  %1570 = vrot.lane.b32.xlu1 %v1566_v8, %s2735_s30  ;;  %v2605_v8 = vld [vmem:[%s3314_s22] ss:$0 sm:$0xff] }
 0x5a4   : > { %v1638_v10 = vpop.f32.mrf.mxu2  ;;  %v1710_v11 = vpop.f32.mrf.mxu0 }
 0x5a5   : > { %1642 = vrot.lane.b32.xlu2 %v1638_v10, %s2736_s6  ;;  %1714 = vrot.lane.b32.xlu0 %v1710_v11, %s2737_s3 }
 0x5de   : > { %v1283_v9 = vpop.permute.xlu0 %1282 }
 0x5df   : > { %1286 = vst.msk [vmem:[#allocation3] sm:$0xff] %vm1285_vm10, %v1283_v9 }
 0x5e6   : > { %v1356_v12 = vpop.permute.xlu0 %1355 }
 0x5e7   : > { %1359 = vst.msk [vmem:[#allocation3] sm:$0xff] %vm1358_vm11, %v1356_v12 }
 0x5ee   : > { %v1571_v13 = vpop.permute.xlu1 %1570  ;;  %v1429_v14 = vpop.permute.xlu0 %1428 }
 0x5ef   : > { %1573 = vst.msk [vmem:[#allocation3 + $0x8] sm:$0xff] %vm1285_vm10, %v1571_v13 }
 0x5f0   : > { %1432 = vst.msk [vmem:[#allocation3] sm:$0xff] %vm1431_vm12, %v1429_v14 }
 0x5f7   : > { %v1718_v19 = vld [vmem:[#allocation3] sm:$0xff] }
 0x5ff   : > { %v1643_v17 = vpop.permute.xlu2 %1642 }
 0x600   : > { %1645 = vst.msk [vmem:[#allocation3 + $0x8] sm:$0xff] %vm1358_vm11, %v1643_v17 }
 0x617   : > { %v1715_v18 = vpop.permute.xlu0 %1714 }
 0x618   : > { %1717 = vst.msk [vmem:[#allocation3 + $0x8] sm:$0xff] %vm1431_vm12, %v1715_v18 }
 0x61f   : > { %v1719_v20 = vld [vmem:[#allocation3 + $0x8] sm:$0xff] }
 0x620   : > { %v1720_v21 = vpack.c.bf16 %v1719_v20, %v1718_v19 }
 0x622   : > { %2488 = vmatmul.msk.bf16.vlgmr.msra.gmra.mxu1 %vm1059_vm8, %v1720_v21 }
 0x69f   : > { %v1753_v23 = vpop.f32.mrf.mxu1 }
 0x6a0   : > { %v1754_v24 = vadd.f32 %v2603_v22, %v1753_v23 }
 0x6a2   : > { %v1758_v25 = vadd.f32 %v1754_v24, %v2978_v53  ;;  %v3112_v53 = vsel %vm1773_vm13, %v2643_v32, %v1772_v36  ;;  %v2551_v36 = vld [vmem:[%s2941_s1 + $0x10] sm:$0xff] }
 0x6a3   : > { %1987 = vmatpush.bf16.msrb.mxu3 %v2551_v36 }
 0x6a4   : > { %v1762_v26 = vsel %vm1059_vm8, %v1758_v25, 0.0 }
 0x6a5   : > { %1763 = vadd.xlane.f32.xlu1 %v1762_v26 }
 0x6a7   : > { %v1755_v27 = vpop.f32.mrf.mxu1 }
 0x6a8   : > { %v1756_v28 = vadd.f32 %v2603_v22, %v1755_v27 }
 0x6aa   : > { %v1759_v29 = vadd.f32 %v1756_v28, %v2980_v54 }
 0x6ac   : > { %v1765_v30 = vsel %vm1059_vm8, %v1759_v29, 0.0 }
 0x6ad   : > { %1766 = vadd.xlane.f32.xlu0 %v1765_v30 }
 0x718   : > { %v1764_v37 = vpop.xlane.xlu1 %1763 }
 0x719   : > { %v1775_v6 = vmul.f32 %v3112_v53, %v1764_v37 }
 0x71b   : > { %v1777_v4 = vsub.f32 %v1758_v25, %v1775_v6 }
 0x71d   : > { %v1779_v54 = vmul.f32 %v1777_v4, %v1777_v4 }
 0x71f   : > { %v1781_v38 = vsel %vm1059_vm8, %v1779_v54, 0.0 }
 0x720   : > { %v1767_v39 = vpop.xlane.xlu0 %1766  ;;  %1782 = vadd.xlane.f32.xlu2 %v1781_v38 }
 0x721   : > { %v1776_v40 = vmul.f32 %v3112_v53, %v1767_v39 }
 0x723   : > { %v1778_v41 = vsub.f32 %v1759_v29, %v1776_v40 }
 0x725   : > { %v1780_v42 = vmul.f32 %v1778_v41, %v1778_v41 }
 0x727   : > { %v1784_v43 = vsel %vm1059_vm8, %v1780_v42, 0.0 }
 0x728   : > { %1785 = vadd.xlane.f32.xlu1 %v1784_v43 }
 0x793   : > { %v1783_v45 = vpop.xlane.xlu2 %1782 }
 0x794   : > { %v1787_v46 = vmul.f32 %v1783_v45, %v3112_v53 }
 0x796   : > { %v1789_v47 = vadd.f32 1e-12, %v1787_v46 }
 0x798   : > { %2644 = vrsqrt.f32 %v1789_v47  ;;  %vm1797_vm15 = vweird.f32 %v1789_v47 }
 0x79b   : > { %v1786_v50 = vpop.xlane.xlu1 %1785 }
 0x79c   : > { %v1788_v51 = vmul.f32 %v1786_v50, %v3112_v53  ;;  %v2549_v50 = vld [vmem:[%s2941_s1] sm:$0xff] }
 0x79e   : > { %v2645_v49 = vpop.eup %2644  ;;  %v1790_v52 = vadd.f32 1e-12, %v1788_v51 }
 0x79f   : > { %v1792_v55 = vmul.f32 %v2645_v49, %v1789_v47  ;;  %vm1798_vm14 = vweird.f32 %v2645_v49 }
 0x7a0   : > { %2646 = vrsqrt.f32 %v1790_v52  ;;  %vm1799_vm0 = vmor %vm1797_vm15, %vm1798_vm14  ;;  %vm1807_vm2 = vweird.f32 %v1790_v52  ;;  %vm1978_vm15 = vcmask 523264  }
 0x7a1   : > { %v1793_v56 = vmul.f32 %v2645_v49, %v1792_v55 }
 0x7a3   : > { %v1794_v57 = vmul.f32 0.5, %v1793_v56 }
 0x7a5   : > { %v1795_v58 = vsub.f32 1.5, %v1794_v57 }
 0x7a6   : > { %v2647_v59 = vpop.eup %2646 }
 0x7a7   : > { %v1796_v60 = vmul.f32 %v2645_v49, %v1795_v58  ;;  %v1802_v61 = vmul.f32 %v2647_v59, %v1790_v52  ;;  %vm1808_vm1 = vweird.f32 %v2647_v59 }
 0x7a8   : > { %vm1809_vm3 = vmor %vm1807_vm2, %vm1808_vm1 }
 0x7a9   : > { %v1803_v62 = vmul.f32 %v2647_v59, %v1802_v61  ;;  %v1800_v63 = vsel %vm1799_vm0, %v2645_v49, %v1796_v60 }
 0x7aa   : > { %v1811_v3 = vmul.f32 %v1800_v63, %v1777_v4 }
 0x7ab   : > { %v1804_v0 = vmul.f32 0.5, %v1803_v62 }
 0x7ac   : > { %v1816_v10 = vmul.f32 %v2604_v2, %v1811_v3 }
 0x7ad   : > { %v1805_v1 = vsub.f32 1.5, %v1804_v0 }
 0x7ae   : > { %v3132_v12 = vadd.f32 %v2605_v8, %v1816_v10 }
 0x7af   : > { %v1806_v5 = vmul.f32 %v2647_v59, %v1805_v1 }
 0x7b1   : > { %v1810_v7 = vsel %vm1809_vm3, %v2647_v59, %v1806_v5 }
 0x7b2   : > { %v1812_v11 = vmul.f32 %v1810_v7, %v1778_v41  ;;  %v2550_v41 = vld [vmem:[%s2941_s1 + $0x8] sm:$0xff] }
 0x7b3   : > { %1988 = vmatpush.bf16.msrb.mxu3 %v2550_v41 }
 0x7b4   : > { %v1817_v9 = vmul.f32 %v2604_v2, %v1812_v11 }
 0x7b6   : > { %v3134_v13 = vadd.f32 %v2605_v8, %v1817_v9 }
 0x7b7   : > { %1989 = vmatpush.bf16.msrb.mxu3 %v2549_v50 }
 0x7b8   : > { %v1823_v14 = vpack.c.bf16 %v3134_v13, %v3132_v12 }
 0x7ba   : > { %2497 = vmatmul.msk.bf16.vlgmr.msra.gmra.mxu2 %vm1059_vm8, %v1823_v14 }
 0x83d   : > { %v1856_v16 = vpop.f32.mrf.mxu2 }
 0x83e   : > { %v3144_v17 = vadd.f32 %v2606_v15, %v1856_v16 }
 0x840   : > { %v3147_v18 = vmul.f32 0.70710677, %v3144_v17 }
 0x842   : > { %v1865_v19 = vand.u32 2147483647, %v3147_v18  ;;  %vm1931_vm13 = vcmp.ge.f32.partialorder %v3147_v18, 0.0  ;;  %v2607_v18 = vld [vmem:[%s956_s20] ss:$0 sm:$0xff] }
 0x844   : > { %v1867_v20 = vmul.f32 0.3275911, %v1865_v19  ;;  %v1919_v38 = vsub.f32 0.0, %v1865_v19 }
 0x845   : > { %v1858_v21 = vpop.f32.mrf.mxu2 }
 0x846   : > { %v1869_v22 = vadd.f32 1.0, %v1867_v20  ;;  %v3150_v23 = vadd.f32 %v2606_v15, %v1858_v21  ;;  %v1921_v45 = vmul.f32 %v1919_v38, %v1865_v19 }
 0x848   : > { %2648 = vrcp.f32 %v1869_v22  ;;  %v3153_v24 = vmul.f32 0.70710677, %v3150_v23  ;;  %v1882_v32 = vand.u32 2147483648, %v1869_v22  ;;  %v1880_v34 = vand.u32 2147483647, %v1869_v22 }
 0x849   : > { %vm1876_vm5 = vweird.f32 %v1869_v22  ;;  %v1923_v55 = vmul.f32 1.442695, %v1921_v45  ;;  %v1862_v31 = vmul.f32 0.5, %v3150_v23 }
 0x84a   : > { %v1866_v25 = vand.u32 2147483647, %v3153_v24  ;;  %v1883_v37 = vor.u32 1.1754944e-38, %v1882_v32  ;;  %vm1881_vm7 = vcmp.eq.f32.partialorder %v1880_v34, 8.507059e+37  ;;  %vm1932_vm14 = vcmp.ge.f32.partialorder %v3153_v24, 0.0 }
 0x84c   : > { %v1868_v26 = vmul.f32 0.3275911, %v1866_v25  ;;  %v1920_v59 = vsub.f32 0.0, %v1866_v25 }
 0x84e   : > { %v2649_v27 = vpop.eup %2648  ;;  %v1870_v29 = vadd.f32 1.0, %v1868_v26  ;;  %v1922_v0 = vmul.f32 %v1920_v59, %v1866_v25 }
 0x84f   : > { %v1872_v28 = vmul.f32 %v2649_v27, %v1869_v22  ;;  %vm1877_vm4 = vweird.f32 %v2649_v27 }
 0x850   : > { %2650 = vrcp.f32 %v1870_v29  ;;  %vm1878_vm6 = vmor %vm1876_vm5, %vm1877_vm4  ;;  %v1897_v44 = vand.u32 2147483648, %v1870_v29  ;;  %v1895_v47 = vand.u32 2147483647, %v1870_v29  ;;  %vm1891_vm10 = vweird.f32 %v1870_v29 }
 0x851   : > { %v1873_v30 = vsub.f32 1.0, %v1872_v28  ;;  %2652 = vpow2.f32 %v1923_v55  ;;  %v1925_v7 = vmul.f32 1.442695, %v1922_v0  ;;  %v2609_v0 = vld [vmem:[%s962_s15] ss:$0 sm:$0xff] }
 0x852   : > { %v1898_v52 = vor.u32 1.1754944e-38, %v1897_v44  ;;  %vm1896_vm12 = vcmp.eq.f32.partialorder %v1895_v47, 8.507059e+37 }
 0x853   : > { %v1874_v33 = vmul.f32 %v2649_v27, %v1873_v30  ;;  %2654 = vpow2.f32 %v1925_v7  ;;  %v1861_v30 = vmul.f32 0.5, %v3144_v17 }
 0x855   : > { %v1875_v35 = vadd.f32 %v2649_v27, %v1874_v33 }
 0x856   : > { %v2651_v6 = vpop.eup %2650 }
 0x857   : > { %v1879_v4 = vsel %vm1878_vm6, %v2649_v27, %v1875_v35  ;;  %v1887_v39 = vmul.f32 %v2651_v6, %v1870_v29  ;;  %vm1892_vm9 = vweird.f32 %v2651_v6  ;;  %v2653_v8 = vpop.eup %2652 }
 0x858   : > { %v1884_v54 = vsel %vm1881_vm7, %v1883_v37, %v1879_v4  ;;  %vm1893_vm11 = vmor %vm1891_vm10, %vm1892_vm9 }
 0x859   : > { %v1901_v40 = vmul.f32 1.0614054, %v1884_v54  ;;  %v1888_v42 = vsub.f32 1.0, %v1887_v39  ;;  %v2655_v21 = vpop.eup %2654 }
 0x85b   : > { %v1903_v43 = vadd.f32 -1.4531521, %v1901_v40  ;;  %v1889_v46 = vmul.f32 %v2651_v6, %v1888_v42 }
 0x85d   : > { %v1905_v48 = vmul.f32 %v1903_v43, %v1884_v54  ;;  %v1890_v51 = vadd.f32 %v2651_v6, %v1889_v46 }
 0x85f   : > { %v1907_v49 = vadd.f32 1.4214138, %v1905_v48  ;;  %v1894_v56 = vsel %vm1893_vm11, %v2651_v6, %v1890_v51 }
 0x860   : > { %v1899_v58 = vsel %vm1896_vm12, %v1898_v52, %v1894_v56 }
 0x861   : > { %v1909_v57 = vmul.f32 %v1907_v49, %v1884_v54  ;;  %v1902_v60 = vmul.f32 1.0614054, %v1899_v58 }
 0x863   : > { %v1911_v61 = vadd.f32 -0.28449672, %v1909_v57  ;;  %v1904_v62 = vadd.f32 -1.4531521, %v1902_v60 }
 0x865   : > { %v1913_v63 = vmul.f32 %v1911_v61, %v1884_v54  ;;  %v1906_v1 = vmul.f32 %v1904_v62, %v1899_v58  ;;  %v2608_v62 = vld [vmem:[%s959_s9] ss:$0 sm:$0xff]  ;;  %s3317_s9 = sld [smem:[#allocation11_spill]] }
 0x867   : > { %v1915_v2 = vadd.f32 0.2548296, %v1913_v63  ;;  %v1908_v3 = vadd.f32 1.4214138, %v1906_v1 }
 0x869   : > { %v1917_v5 = vmul.f32 %v1915_v2, %v1884_v54  ;;  %v1910_v10 = vmul.f32 %v1908_v3, %v1899_v58 }
 0x86b   : > { %v1927_v11 = vmul.f32 %v2653_v8, %v1917_v5  ;;  %v1912_v9 = vadd.f32 -0.28449672, %v1910_v10  ;;  %p2515_p5 = scmp.ne.s32.totalorder %s3317_s9, 1 }
 0x86c   : > { %s3318_s21 = sld [smem:[#allocation25_spill]] (!%p2515_p5) }
 0x86d   : > { %v1929_v14 = vsub.f32 1.0, %v1927_v11  ;;  %v1914_v15 = vmul.f32 %v1912_v9, %v1899_v58  ;;  %s3319_s7 = sld [smem:[#allocation14_spill]] (!%p2515_p5) }
 0x86e   : > { %s3320_s1 = sld [smem:[#allocation26_spill]] (!%p2515_p5) }
 0x86f   : > { %v1916_v16 = vadd.f32 0.2548296, %v1914_v15  ;;  %v1933_v19 = vsub.f32 0.0, %v1929_v14 }
 0x871   : > { %v1918_v20 = vmul.f32 %v1916_v16, %v1899_v58  ;;  %v1935_v25 = vsel %vm1931_vm13, %v1929_v14, %v1933_v19 }
 0x872   : > { %v1937_v28 = vadd.f32 1.0, %v1935_v25 }
 0x873   : > { %v1928_v22 = vmul.f32 %v2655_v21, %v1918_v20 }
 0x874   : > { %v1939_v33 = vmul.f32 %v1937_v28, %v1861_v30 }
 0x875   : > { %v1930_v26 = vsub.f32 1.0, %v1928_v22 }
 0x877   : > { %v1934_v27 = vsub.f32 0.0, %v1930_v26 }
 0x879   : > { %v1936_v29 = vsel %vm1932_vm14, %v1930_v26, %v1934_v27 }
 0x87a   : > { %v1938_v32 = vadd.f32 1.0, %v1936_v29 }
 0x87c   : > { %v1940_v34 = vmul.f32 %v1938_v32, %v1862_v31 }
 0x87e   : > { %v1941_v35 = vpack.c.bf16 %v1940_v34, %v1939_v33 }
 0x880   : > { %2514 = vmatmul.msk.bf16.vlgmr.msrb.gmra.mxu3 %vm1978_vm15, %v1941_v35 }
 0x903   : > { %v1991_v36 = vpop.f32.mrf.mxu3 }
 0x904   : > { %v1992_v37 = vadd.f32 %v2607_v18, %v1991_v36 }
 0x906   : > { %v1996_v24 = vadd.f32 %v1992_v37, %v3132_v12 }
 0x908   : > { %v2000_v6 = vsel %vm1059_vm8, %v1996_v24, 0.0 }
 0x909   : > { %2001 = vadd.xlane.f32.xlu2 %v2000_v6 }
 0x90b   : > { %v1993_v17 = vpop.f32.mrf.mxu3 }
 0x90c   : > { %v1994_v23 = vadd.f32 %v2607_v18, %v1993_v17 }
 0x90e   : > { %v1997_v4 = vadd.f32 %v1994_v23, %v3134_v13 }
 0x910   : > { %v2003_v54 = vsel %vm1059_vm8, %v1997_v4, 0.0 }
 0x911   : > { %2004 = vadd.xlane.f32.xlu0 %v2003_v54 }
 0x97c   : > { %v2002_v38 = vpop.xlane.xlu2 %2001 }
 0x97d   : > { %v2006_v39 = vmul.f32 %v2002_v38, %v3112_v53 }
 0x97f   : > { %v2008_v40 = vsub.f32 %v1996_v24, %v2006_v39 }
 0x981   : > { %v2010_v41 = vmul.f32 %v2008_v40, %v2008_v40 }
 0x983   : > { %v2012_v42 = vsel %vm1059_vm8, %v2010_v41, 0.0 }
 0x984   : > { %v2005_v43 = vpop.xlane.xlu0 %2004  ;;  %2013 = vadd.xlane.f32.xlu1 %v2012_v42 }
 0x985   : > { %v2007_v12 = vmul.f32 %v2005_v43, %v3112_v53 }
 0x987   : > { %v2009_v44 = vsub.f32 %v1997_v4, %v2007_v12 }
 0x989   : > { %v2011_v45 = vmul.f32 %v2009_v44, %v2009_v44 }
 0x98b   : > { %v2015_v46 = vsel %vm1059_vm8, %v2011_v45, 0.0 }
 0x98c   : > { %2016 = vadd.xlane.f32.xlu2 %v2015_v46 }
 0x9f7   : > { %v2014_v13 = vpop.xlane.xlu1 %2013 }
 0x9f8   : > { %v2018_v47 = vmul.f32 %v2014_v13, %v3112_v53 }
 0x9fa   : > { %v2020_v48 = vadd.f32 1e-12, %v2018_v47 }
 0x9fc   : > { %2656 = vrsqrt.f32 %v2020_v48  ;;  %vm2028_vm1 = vweird.f32 %v2020_v48 }
 0x9ff   : > { %v2017_v50 = vpop.xlane.xlu2 %2016 }
 0xa00   : > { %v2019_v51 = vmul.f32 %v2017_v50, %v3112_v53 }
 0xa02   : > { %v2657_v49 = vpop.eup %2656  ;;  %v2021_v52 = vadd.f32 1e-12, %v2019_v51 }
 0xa03   : > { %v2023_v55 = vmul.f32 %v2657_v49, %v2020_v48  ;;  %vm2029_vm0 = vweird.f32 %v2657_v49 }
 0xa04   : > { %2658 = vrsqrt.f32 %v2021_v52  ;;  %vm2030_vm2 = vmor %vm2028_vm1, %vm2029_vm0  ;;  %vm2038_vm4 = vweird.f32 %v2021_v52 }
 0xa05   : > { %v2024_v56 = vmul.f32 %v2657_v49, %v2023_v55 }
 0xa07   : > { %v2025_v57 = vmul.f32 0.5, %v2024_v56 }
 0xa09   : > { %v2026_v58 = vsub.f32 1.5, %v2025_v57 }
 0xa0a   : > { %v2659_v59 = vpop.eup %2658 }
 0xa0b   : > { %v2027_v60 = vmul.f32 %v2657_v49, %v2026_v58  ;;  %v2033_v61 = vmul.f32 %v2659_v59, %v2021_v52  ;;  %vm2039_vm3 = vweird.f32 %v2659_v59 }
 0xa0c   : > { %vm2040_vm5 = vmor %vm2038_vm4, %vm2039_vm3 }
 0xa0d   : > { %v2031_v53 = vsel %vm2030_vm2, %v2657_v49, %v2027_v60  ;;  %v2034_v63 = vmul.f32 %v2659_v59, %v2033_v61 }
 0xa0e   : > { %v2042_v1 = vmul.f32 %v2031_v53, %v2008_v40 }
 0xa0f   : > { %v2035_v2 = vmul.f32 0.5, %v2034_v63 }
 0xa10   : > { %v2047_v3 = vmul.f32 %v2608_v62, %v2042_v1 }
 0xa11   : > { %v2036_v5 = vsub.f32 1.5, %v2035_v2 }
 0xa12   : > { %v2052_v7 = vadd.f32 %v2609_v0, %v2047_v3 }
 0xa13   : > { %v2037_v8 = vmul.f32 %v2659_v59, %v2036_v5 }
 0xa14   : > { %2054 = vst.msk [vmem:[#allocation2] sm:$0xff] %vm1059_vm8, %v2052_v7 }
 0xa15   : > { %v2041_v10 = vsel %vm2040_vm5, %v2659_v59, %v2037_v8 }
 0xa16   : > { %v2043_v11 = vmul.f32 %v2041_v10, %v2009_v44 }
 0xa18   : > { %v2048_v9 = vmul.f32 %v2608_v62, %v2043_v11  ;;  %2059 = sbr.rel (%p2515_p5) target bundleno = 3060 (0xbf4), region = 120 }
 0xa1a   : > { %v2053_v14 = vadd.f32 %v2609_v0, %v2048_v9 }
 0xa1c   : > { %2055 = vst.msk [vmem:[#allocation2 + $0x8] sm:$0xff] %vm1059_vm8, %v2053_v14 }
 0xa1d   : > { %v2554_v15 = vld [vmem:[%s3318_s21 + $0x8] sm:$0xff]  ;;  %v2100_v16 = vld [vmem:[%s3319_s7] sm:$0xff]  ;;  %vm2148_vm6 = vcmask 7168   ;;  %v2739_v19 = vmov 0   ;;  %v2740_v22 = vmov 0.0   ;;  %v2060_v29 = vpack.c.bf16 %v2053_v14, %v2052_v7 }
 0xa1e   : > { %2660 = vset.pattern.permute.xlu1 %v2739_v19  ;;  %vm2138_vm7 = vcmp.ne.s32.totalorder %v2100_v16, 4294967196  ;;  %v2101_v20 = vld [vmem:[%s3319_s7 + $0x8] sm:$0xff]  ;;  %2661 = vset.pattern.permute.xlu0 %v2739_v19  ;;  %v2553_v21 = vld [vmem:[%s3318_s21] sm:$0xff]  ;;  %v2122_v35 = vlaneseq }
 0xa1f   : > { %2090 = vmatpush.bf16.msra.mxu0 %v2554_v15  ;;  %2125 = vperm.xlu1 %2660, %v2100_v16   ;;  %v3204_v25 = vsel %vm2138_vm7, 1.0, %v2740_v22  ;;  %vm2139_vm9 = vcmp.ne.s32.totalorder %v2101_v20, 4294967196  ;;  %v2662_v32 = vld [vmem:[%s3320_s1] ss:$0 sm:$0xff] }
 0xa20   : > { %v2158_v26 = vsel %vm2148_vm6, %v3204_v25, 0.0  ;;  %v3208_v27 = vsel %vm2139_vm9, 1.0, %v2740_v22  ;;  %v2123_v36 = vand.u32 127, %v2122_v35 }
 0xa21   : > { %v2159_v28 = vsel %vm2148_vm6, %v3208_v27, 0.0 }
 0xa22   : > { %v2160_v30 = vadd.f32 %v2159_v28, %v2158_v26 }
 0xa23   : > { %2091 = vmatpush.bf16.msra.mxu0 %v2553_v21 }
 0xa24   : > { %v2161_v43 = vrot.slane %v2160_v30, 4 }
 0xa26   : > { %2524 = vmatmul.msk.bf16.vlgmr.msra.gmra.mxu0 %vm1059_vm8, %v2060_v29  ;;  %v2162_v12 = vadd.f32 %v2161_v43, %v2160_v30 }
 0xa27   : > { %2128 = vperm.xlu1 %2660, %v2101_v20  }
 0xa28   : > { %v2163_v44 = vrot.slane %v2162_v12, 2 }
 0xa2a   : > { %v2164_v45 = vadd.f32 %v2163_v44, %v2162_v12 }
 0xa2c   : > { %v2165_v46 = vrot.slane %v2164_v45, 1 }
 0xa2e   : > { %v2166_v13 = vadd.f32 %v2165_v46, %v2164_v45 }
 0xa30   : > { %v2167_v48 = vmax.f32 %v2166_v13, 1.0 }
 0xa32   : > { %vm2173_vm11 = vweird.f32 %v2167_v48  ;;  %v2179_v10 = vand.u32 2147483648, %v2167_v48  ;;  %v2177_v14 = vand.u32 2147483647, %v2167_v48 }
 0xa34   : > { %v2180_v16 = vor.u32 1.1754944e-38, %v2179_v10  ;;  %vm2178_vm14 = vcmp.eq.f32.partialorder %v2177_v14, 8.507059e+37 }
 0xa91   : > { %v2126_v31 = vpop.permute.xlu1 %2125 }
 0xa92   : > { %vm2130_vm8 = vcmp.eq.s32.totalorder %v2123_v36, %v2126_v31 }
 0xa99   : > { %v2129_v18 = vpop.permute.xlu1 %2128 }
 0xa9a   : > { %vm2131_vm10 = vcmp.eq.s32.totalorder %v2123_v36, %v2129_v18 }
 0xaa3   : > { %v2093_v33 = vpop.f32.mrf.mxu0 }
 0xaa4   : > { %v2094_v34 = vadd.f32 %v2662_v32, %v2093_v33 }
 0xaa6   : > { %2098 = vst [vmem:[#allocation4] sm:$0xff] %v2094_v34  ;;  %2102 = vmax.xlane.f32.xlu0 %v2094_v34  ;;  %v2132_v17 = vsel %vm2130_vm8, %v2094_v34, 0.0 }
 0xaab   : > { %v2095_v37 = vpop.f32.mrf.mxu0 }
 0xaac   : > { %v2096_v24 = vadd.f32 %v2662_v32, %v2095_v37 }
 0xaae   : > { %2099 = vst [vmem:[#allocation4 + $0x8] sm:$0xff] %v2096_v24  ;;  %2104 = vmax.xlane.f32.xlu0 %v2096_v24  ;;  %v2133_v6 = vsel %vm2131_vm10, %v2096_v24, 0.0 }
 0xaaf   : > { %2136 = vadd.xlane.f32.xlu1 %v2133_v6 }
 0xab6   : > { %2134 = vadd.xlane.f32.xlu0 %v2132_v17 }
 0xb19   : > { %v2103_v23 = vpop.xlane.xlu0 %2102 }
 0xb1a   : > { %v2106_v4 = vsub.f32 %v2094_v34, %v2103_v23 }
 0xb1c   : > { %v2108_v54 = vmul.f32 1.442695, %v2106_v4 }
 0xb1e   : > { %2663 = vpow2.f32 %v2108_v54 }
 0xb21   : > { %v2105_v38 = vpop.xlane.xlu0 %2104 }
 0xb22   : > { %v2107_v39 = vsub.f32 %v2096_v24, %v2105_v38  ;;  %v2137_v62 = vpop.xlane.xlu1 %2136 }
 0xb24   : > { %v2664_v40 = vpop.eup %2663  ;;  %v2110_v41 = vmul.f32 1.442695, %v2107_v39 }
 0xb25   : > { %2112 = vadd.xlane.f32.xlu2 %v2664_v40 }
 0xb26   : > { %2665 = vpow2.f32 %v2110_v41 }
 0xb29   : > { %v2135_v57 = vpop.xlane.xlu0 %2134 }
 0xb2c   : > { %v2666_v42 = vpop.eup %2665 }
 0xb2d   : > { %2114 = vadd.xlane.f32.xlu2 %v2666_v42 }
 0xb98   : > { %v2113_v47 = vpop.xlane.xlu2 %2112 }
 0xb99   : > { %2667 = vlog2.f32 %v2113_v47 }
 0xb9a   : > { %2669 = vrcp.f32 %v2167_v48 }
 0xb9f   : > { %v2668_v50 = vpop.eup %2667 }
 0xba0   : > { %v2117_v51 = vmul.f32 0.6931472, %v2668_v50  ;;  %v2115_v49 = vpop.xlane.xlu2 %2114  ;;  %v2670_v55 = vpop.eup %2669 }
 0xba1   : > { %2671 = vlog2.f32 %v2115_v49  ;;  %v2169_v60 = vmul.f32 %v2670_v55, %v2167_v48  ;;  %vm2174_vm12 = vweird.f32 %v2670_v55 }
 0xba2   : > { %v2120_v52 = vadd.f32 %v2117_v51, %v2103_v23  ;;  %vm2175_vm13 = vmor %vm2173_vm11, %vm2174_vm12 }
 0xba3   : > { %v2170_v0 = vsub.f32 1.0, %v2169_v60 }
 0xba4   : > { %v2144_v58 = vsub.f32 %v2120_v52, %v2135_v57 }
 0xba5   : > { %v2171_v7 = vmul.f32 %v2670_v55, %v2170_v0 }
 0xba6   : > { %v2146_v53 = vmul.f32 %v3204_v25, %v2144_v58 }
 0xba7   : > { %v2672_v56 = vpop.eup %2671  ;;  %v2172_v9 = vadd.f32 %v2670_v55, %v2171_v7 }
 0xba8   : > { %v2119_v59 = vmul.f32 0.6931472, %v2672_v56  ;;  %v2149_v2 = vsel %vm2148_vm6, %v2146_v53, 0.0 }
 0xba9   : > { %v2176_v20 = vsel %vm2175_vm13, %v2670_v55, %v2172_v9 }
 0xbaa   : > { %v2121_v61 = vadd.f32 %v2119_v59, %v2105_v38  ;;  %v2181_v22 = vsel %vm2178_vm14, %v2180_v16, %v2176_v20 }
 0xbac   : > { %v2145_v63 = vsub.f32 %v2121_v61, %v2137_v62 }
 0xbae   : > { %v2147_v1 = vmul.f32 %v3208_v27, %v2145_v63 }
 0xbb0   : > { %v2150_v3 = vsel %vm2148_vm6, %v2147_v1, 0.0 }
 0xbb1   : > { %v2151_v5 = vadd.f32 %v2150_v3, %v2149_v2 }
 0xbb3   : > { %v2152_v8 = vrot.slane %v2151_v5, 4 }
 0xbb5   : > { %v2153_v11 = vadd.f32 %v2152_v8, %v2151_v5 }
 0xbb7   : > { %v2154_v15 = vrot.slane %v2153_v11, 2 }
 0xbb9   : > { %v2155_v19 = vadd.f32 %v2154_v15, %v2153_v11 }
 0xbbb   : > { %v2156_v21 = vrot.slane %v2155_v19, 1 }
 0xbbd   : > { %v2157_v25 = vadd.f32 %v2156_v21, %v2155_v19 }
 0xbbf   : > { %v2182_v26 = vmul.f32 %v2181_v22, %v2157_v25 }
 0xbc1   : > { %2555 = vpush %v2182_v26 }
 0xbf2   : > { %s2556_s2 = spop %2555 }
 0xbf3   : > { %2185 = sst [smem:[#allocation7]] %s2556_s2 }
 0xbf4 PF: > { %s3321_s20 = sld [smem:[#allocation11_spill]]  ;;  %s2741_s6 = smov [#allocation4]  }
 0xbf5   : > { %s2191_s3 = sshll.u32 %s2741_s6, 4  ;;  %s3322_s9 = sld [smem:[#allocation27_spill]]  ;;  %s2192_s3 = int_to_ptr.vmem [resolvable:$true] %s2191_s3 }
 0xbf6   : > { %s3323_s29 = sld [smem:[#allocation28_spill]]  ;;  %s2742_s23 = smov 128  }
 0xbf7   : > { %s2743_s22 = smov [#allocation7]  }
 0xbfa   : > { %p2565_p6 = scmp.eq.s32.totalorder %s3321_s20, 1 }
 0xbfb   : > { %s2193_s15 = sshll.u32 %s3322_s9, 4  ;;  %s2194_s15 = int_to_ptr.hbm [resolvable:$true] %s2193_s15 }
 0xbfc   : > { %s2206_s24 = sshll.u32 %s3323_s29, 4  ;;  %s2207_s24 = int_to_ptr.hbm [resolvable:$true] %s2206_s24 }
 0xbfd   : > { %2558 = dma.vmem_to_hbm [thread:$0]  (%p2565_p6), %s2192_s3, 256, %s2194_s15, [#allocation5], %s2742_s23, %s2742_s23, %s2735_s30  }
 0xbfe   : > { %2560 = dma.smem_to_hbm (%p2565_p6), %s2743_s22, 16, %s2207_s24, [#allocation6]  }
 0xbff   : > { %2720 = dma.done.wait (%p2565_p6), [#allocation5], 256  }
 0xc00   : > { %2722 = vsyncadd (%p2565_p6), [#allocation5], 4294967040 }
 0xc01   : > { %2724 = dma.done.wait (%p2565_p6), [#allocation6], 16  }
 0xc02   : > { %2726 = vsyncadd (%p2565_p6), [#allocation6], 4294967280 }
 0xc03   : > { %2220 = sfence }
 0xc04 PF: > { %s3324_s26 = sld [smem:[#allocation10_spill]] }
 0xc0a   : > { %s37_s5 = sadd.s32 1, %s3324_s26  }
 0xc0b   : > { %p34_p7 = scmp.ge.s32.totalorder %s37_s5, 4  }
 0xc0d   :  { %36 = sbr.rel (!%p34_p7) target bundleno = 20 (0x14), region = 203 }
 0xc12   :  { %2226 = vsyncpa [#allocation5], 1 }
 0xc13   :  { %2228 = vsyncpa [#allocation5 + $0x1], 1 }
 0xc14   :  { %2229 = vsyncpa [#allocation6], 1 }
 0xc15   :  { %2231 = vsyncpa [#allocation6 + $0x1], 1 }

</bundles_post_ra>
